<compile_context>
chip_gen: v5e
topology: v5e:2x2
jax: 0.10.0
libtpu: 0.0.40
codegen_flags: <defaults>
</compile_context>

<pallas_src>
import functools

import jax
import jax.numpy as jnp
from jax.experimental import pallas as pl
from jax.experimental.pallas import tpu as pltpu


def _round_up(x, m):
    return ((x + m - 1) // m) * m


def _bilinear_kernel(x_ref, w_ref, o_ref, *, n):
    # x_ref: (TB, N)        compute dtype (bf16 by default)
    # w_ref: (N*N, OUT_pad) compute dtype; constant block index -> resident across batch tiles
    # o_ref: (TB, OUT_pad)  f32
    x = x_ref[...]                                            # (TB, N)
    tb = x.shape[0]
    # Pairwise products p[b, i*N + j] = x[b, i] * x[b, j]  (VPU broadcast multiply).
    p = (x[:, :, None] * x[:, None, :]).reshape(tb, n * n)    # (TB, N*N)
    # One well-shaped MXU GEMM with a large contraction dim and lane-dense output.
    y = jnp.dot(p, w_ref[...], preferred_element_type=jnp.float32)
    o_ref[...] = y.astype(o_ref.dtype)


def bilinear_pallas(x, w_full, *, batch_tile=256, compute_dtype=jnp.bfloat16):
    """x: (B, N) f32, w_full: (N, N, OUT) f32 -> (B, OUT) f32."""
    B, N = x.shape
    assert w_full.shape[0] == N and w_full.shape[1] == N
    OUT = w_full.shape[2]

    OUT_pad = _round_up(OUT, 128)                 # lane-dense output (>= 128 wide)
    bt = min(batch_tile, _round_up(B, 16))        # batch tile, multiple of 16 (bf16 packing)
    bt = _round_up(bt, 16)
    B_pad = _round_up(B, bt)

    # Wrapper glue: flatten, cast, zero-pad the weight once -> (N*N, OUT_pad).
    w_flat = w_full.reshape(N * N, OUT).astype(compute_dtype)
    if OUT_pad != OUT:
        w_flat = jnp.pad(w_flat, ((0, 0), (0, OUT_pad - OUT)))

    xp = x.astype(compute_dtype)
    if B_pad != B:
        xp = jnp.pad(xp, ((0, B_pad - B), (0, 0)))

    itemsize = jnp.dtype(compute_dtype).itemsize
    w_bytes = N * N * OUT_pad * itemsize
    vmem_limit = (2 * w_bytes                     # pipelined resident weight (2 buffers)
                  + 2 * bt * N * itemsize         # double-buffered x tiles
                  + 2 * bt * OUT_pad * 4          # double-buffered out tiles
                  + 2 * bt * N * N * itemsize     # in-kernel pairwise-product temporary
                  + (8 << 20))                    # headroom
    vmem_limit = int(min(max(vmem_limit, 16 << 20), 96 << 20))

    cost = pl.CostEstimate(
        flops=2 * B_pad * (N * N) * OUT_pad + B_pad * N * N,
        transcendentals=0,
        bytes_accessed=B_pad * N * itemsize + w_bytes + B_pad * OUT_pad * 4,
    )

    kernel = functools.partial(_bilinear_kernel, n=N)
    out = pl.pallas_call(
        kernel,
        out_shape=jax.ShapeDtypeStruct((B_pad, OUT_pad), jnp.float32),
        grid_spec=pltpu.PrefetchScalarGridSpec(
            num_scalar_prefetch=0,
            grid=(B_pad // bt,),
            in_specs=[
                pl.BlockSpec((bt, N), lambda b: (b, 0)),             # streamed batch tiles
                pl.BlockSpec((N * N, OUT_pad), lambda b: (0, 0)),    # constant index: fetched once
            ],
            out_specs=pl.BlockSpec((bt, OUT_pad), lambda b: (b, 0)),
        ),
        compiler_params=pltpu.CompilerParams(
            # Batch tiles are independent; weight block index is constant so each megacore
            # fetches its own resident copy -> safe to shard across v7x cores.
            dimension_semantics=("parallel",),
            vmem_limit_bytes=vmem_limit,
        ),
        cost_estimate=cost,
    )(xp, w_flat)
    return out[:B, :OUT]


def make_tucker_weight(key, n, out, rank_frac=0.05, std=0.00075):
    """Deterministic synthetic TRL weight via a Tucker (low-rank) decomposition.

    W[i, j, o] = sum_{a,b,c} core[a,b,c] * U1[i,a] * U2[j,b] * U3[o,c], rescaled so the
    reconstructed tensor has std ~= `std` (mirrors trl.weight.normal_(std=0.00075)).
    """
    r1 = max(1, int(round(rank_frac * n)))
    r2 = max(1, int(round(rank_frac * n)))
    r3 = max(1, int(round(rank_frac * out)))
    k_core, k1, k2, k3 = jax.random.split(key, 4)
    core = jax.random.normal(k_core, (r1, r2, r3), dtype=jnp.float32)
    u1 = jax.random.normal(k1, (n, r1), dtype=jnp.float32)
    u2 = jax.random.normal(k2, (n, r2), dtype=jnp.float32)
    u3 = jax.random.normal(k3, (out, r3), dtype=jnp.float32)
    w = jnp.einsum("abc,ia,jb,oc->ijo", core, u1, u2, u3)
    w = w * (std / (jnp.std(w) + 1e-12))
    return w


def bilinear_reference(x, w_full):
    # Pure-JAX reference of the module: y[b,o] = sum_{i,j} x[b,i] x[b,j] W[i,j,o]
    outer = jnp.einsum("bi,bj->bij", x, x, precision=jax.lax.Precision.HIGHEST)
    return jnp.einsum("bij,ijo->bo", outer, w_full, precision=jax.lax.Precision.HIGHEST)


if __name__ == "__main__":
    key = jax.random.PRNGKey(0)
    kx, kw = jax.random.split(key)

    B, N = 8, 32          # batch=8, n=32 input features
    OUT = N               # out defaults to n in the module

    x = jax.random.normal(kx, (B, N), dtype=jnp.float32)
    w_full = make_tucker_weight(kw, N, OUT, rank_frac=0.05, std=0.00075)

    # 1) f32 compute path: verifies kernel indexing/math against exact module semantics.
    y_f32 = jax.block_until_ready(bilinear_pallas(x, w_full, compute_dtype=jnp.float32))
    y_ref = bilinear_reference(x, w_full)
    assert y_f32.shape == (B, OUT)
    assert jnp.allclose(y_f32, y_ref, atol=1e-5, rtol=1e-5), "f32 kernel mismatch vs reference"

    # 2) Default bf16 MXU path: compare against a precision-matched reference
    #    (same bf16 quantization of x, W and the pairwise products; f32 accumulation).
    y_bf16 = jax.block_until_ready(bilinear_pallas(x, w_full))
    xq = x.astype(jnp.bfloat16).astype(jnp.float32)
    wq = w_full.astype(jnp.bfloat16).astype(jnp.float32)
    pq = (xq[:, :, None] * xq[:, None, :]).astype(jnp.bfloat16).astype(jnp.float32)
    y_ref_bf16 = jnp.einsum("bij,ijo->bo", pq, wq, precision=jax.lax.Precision.HIGHEST)
    scale = jnp.maximum(jnp.max(jnp.abs(y_ref_bf16)), 1e-6)
    assert y_bf16.shape == (B, OUT)
    assert float(jnp.max(jnp.abs(y_bf16 - y_ref_bf16)) / scale) < 1e-2, "bf16 kernel mismatch"

    # bias=False is the module default; no bias term added.
    print("KERNEL_OK")
</pallas_src>

<mosaic_0001>
module attributes {stable_mosaic.version = 11 : i64} {
  func.func @_bilinear_kernel(%arg0: i32, %arg1: memref<16x32xf32, #tpu.memory_space<vmem>>, %arg2: memref<1024x128xf32, #tpu.memory_space<vmem>>, %arg3: memref<16x128xf32, #tpu.memory_space<vmem>>) attributes {dimension_semantics = [#tpu.dimension_semantics<parallel>], iteration_bounds = array<i64: 1>, scalar_prefetch = 0 : i64, scratch_operands = 0 : i64, tpu.core_type = #tpu.core_type<tc>, window_params = [{transform_indices = @transform_0, window_bounds = array<i64: 16, 32>}, {pipeline_mode = #tpu.pipeline_mode<synchronous>, transform_indices = @transform_1, window_bounds = array<i64: 1024, 128>}, {transform_indices = @transform_2, window_bounds = array<i64: 16, 128>}]} {
    %c0 = arith.constant 0 : index
    %c0_0 = arith.constant 0 : index
    %0 = vector.load %arg1[%c0, %c0_0] : memref<16x32xf32, #tpu.memory_space<vmem>>, vector<16x32xf32>
    %1 = vector.shape_cast %0 : vector<16x32xf32> to vector<16x32x1xf32>
    %2 = vector.shape_cast %0 : vector<16x32xf32> to vector<16x1x32xf32>
    %3 = vector.broadcast %1 : vector<16x32x1xf32> to vector<16x32x32xf32>
    %4 = vector.broadcast %2 : vector<16x1x32xf32> to vector<16x32x32xf32>
    %5 = arith.mulf %3, %4 : vector<16x32x32xf32>
    %6 = vector.shape_cast %5 : vector<16x32x32xf32> to vector<16x1024xf32>
    %c0_1 = arith.constant 0 : index
    %c0_2 = arith.constant 0 : index
    %7 = vector.load %arg2[%c0_1, %c0_2] : memref<1024x128xf32, #tpu.memory_space<vmem>>, vector<1024x128xf32>
    %cst = arith.constant dense<0.000000e+00> : vector<16x128xf32>
    %8 = tpu.matmul %6, %7, %cst {dimension_numbers = #tpu.dot_dimension_numbers<[1], [0], [0], [1], [0, 0, 1, 1], [], []>} : vector<16x1024xf32>, vector<1024x128xf32>, vector<16x128xf32> -> vector<16x128xf32>
    %c0_3 = arith.constant 0 : index
    %c0_4 = arith.constant 0 : index
    %9 = vector.load %arg3[%c0_3, %c0_4] : memref<16x128xf32, #tpu.memory_space<vmem>>, vector<16x128xf32>
    tpu.vector_store %arg3[%c0_3, %c0_4], %8 {strides = array<i32>} : memref<16x128xf32, #tpu.memory_space<vmem>>, vector<16x128xf32>,
    return
  }
  func.func @transform_0(%arg0: i32) -> (i32, i32) {
    %c0_i32 = arith.constant 0 : i32
    %c0_i32_0 = arith.constant 0 : i32
    return %arg0, %c0_i32 : i32, i32
  }
  func.func @transform_1(%arg0: i32) -> (i32, i32) {
    %c0_i32 = arith.constant 0 : i32
    %c0_i32_0 = arith.constant 0 : i32
    %c0_i32_1 = arith.constant 0 : i32
    return %c0_i32, %c0_i32_0 : i32, i32
  }
  func.func @transform_2(%arg0: i32) -> (i32, i32) {
    %c0_i32 = arith.constant 0 : i32
    %c0_i32_0 = arith.constant 0 : i32
    return %arg0, %c0_i32 : i32, i32
  }
}

</mosaic_0001>

<bundles_post_ra>
// kernel: tpu_custom_call.1
= control target key start
LH: loop header
LB: loop body
LE: loop exit
PB: predicated region body
PF: predicated region fallthrough
CT: control target
= control target key end

     0   :  { %7 = vsyncpa [#allocation3], 0  ;;  %s3427_s0 = inlined_call_operand.hbm [shape: f32[16,32], index: 0, kind: input, shape index: {}]   ;;  %s3428_s1 = inlined_call_operand.hbm [shape: f32[1024,128], index: 1, kind: input, shape index: {}]   ;;  %s3429_s2 = inlined_call_operand.hbm [shape: f32[16,128], index: 2, kind: output, shape index: {}]  }
   0x1   :  { %8 = vsyncpa [#allocation6], 0 }
   0x2   :  { %9 = vsyncpa [#allocation4], 0  ;;  %s14_s11 = sshll.u32 %s3427_s0, 4  ;;  %s2290_s12 = smov [#allocation2]   ;;  %s15_s11 = int_to_ptr.hbm [resolvable:$true] %s14_s11 }
   0x3   :  { %s16_s13 = sshll.u32 %s2290_s12, 4  ;;  %s27_s16 = sshll.u32 %s3428_s1, 4  ;;  %s17_s13 = int_to_ptr.vmem [resolvable:$true] %s16_s13  ;;  %s28_s16 = int_to_ptr.hbm [resolvable:$true] %s27_s16 }
   0x4   :  { %s2291_s17 = smov 128   ;;  %s2292_s18 = smov 8  }
   0x5   :  { %22 = dma.hbm_to_vmem [thread:$0]  %s15_s11, 256, %s17_s13, [#allocation3], %s2291_s17, %s2291_s17, %s2292_s18  }
   0x6   :  { %s2293_s19 = smov [#allocation5]  }
   0x7   :  { %s29_s20 = sshll.u32 %s2293_s19, 4  ;;  %s30_s20 = int_to_ptr.vmem [resolvable:$true] %s29_s20 }
   0x8   :  { %35 = dma.hbm_to_vmem [thread:$0]  %s28_s16, 16384, %s30_s20, [#allocation6], %s2291_s17, %s2291_s17, %s2292_s18  }
   0x9   :  { %2284 = dma.done.wait [#allocation3], 256  }
   0xa   :  { %2285 = vsyncadd [#allocation3], 4294967040 }
   0xb   :  { %2286 = dma.done.wait [#allocation6], 16384  }
   0xc   :  { %2287 = vsyncadd [#allocation6], 4294950912  ;;  %v47_v0 = vlaneseq  ;;  %v2338_v4 = vld [vmem:[#allocation2] sm:$0xff]  ;;  %v2352_v9 = vld [vmem:[#allocation2 + $0x8] sm:$0xff]  ;;  %vm559_vm0 = vcmask 1047556   ;;  %s2296_s0 = smov 64  }
   0xd   :  { %v71_v5 = vperm.slane %v2338_v4, 1  ;;  %v2342_v6 = vperm.slane %v2338_v4, 0  ;;  %v121_v8 = vperm.slane %v2338_v4, 3  ;;  %v2355_v10 = vperm.slane %v2352_v9, 0  ;;  %s2297_s1 = smov 32   ;;  %s2298_s21 = smov 96  }
   0xe   :  { %v2327_v1 = vshrl.u32 %v47_v0, 7  ;;  %v2360_v11 = vperm.slane %v2352_v9, 7  ;;  %v96_v12 = vperm.slane %v2338_v4, 2  ;;  %v2373_v13 = vperm.slane %v2338_v4, 7  ;;  %s2299_s22 = smov [#allocation7]   ;;  %s2018_s26 = sshll.u32 %s3429_s2, 4  ;;  %s2019_s26 = int_to_ptr.hbm [resolvable:$true] %s2018_s26 }
   0xf   :  { %v2379_v14 = vperm.slane %v2352_v9, 4  ;;  %v146_v15 = vperm.slane %v2338_v4, 4  ;;  %v171_v16 = vperm.slane %v2338_v4, 5  ;;  %v2390_v18 = vperm.slane %v2352_v9, 2  ;;  %s2016_s23 = sshll.u32 %s2299_s22, 4  ;;  %s2017_s23 = int_to_ptr.vmem [resolvable:$true] %s2016_s23 }
  0x10   :  { %2043 = vset.pattern.permute.xlu2 %v2327_v1  ;;  %v2331_v2 = vadd.s32 16, %v2327_v1  ;;  %v2334_v3 = vadd.s32 8, %v2327_v1  ;;  %v2347_v7 = vadd.s32 24, %v2327_v1  ;;  %v448_v20 = vrot.slane %v2338_v4, 1 }
  0x11   :  { %v449_v24 = vrot.slane %v2338_v4, 2  ;;  %v196_v32 = vperm.slane %v2338_v4, 6  ;;  %v450_v39 = vrot.slane %v2338_v4, 3  ;;  %v2294_v43 = vmov 1983009808  }
  0x12   :  { %2044 = vset.pattern.permute.xlu1 %v2331_v2  ;;  %2042 = vset.pattern.permute.xlu0 %v2334_v3  ;;  %v2399_v21 = vperm.slane %v448_v20, 0  ;;  %v564_v44 = vunpack.c.l.s4 %v2294_v43  ;;  %vm1647_vm1 = vcmask 261120   ;;  %vm1653_vm2 = vcmask 785408  }
  0x13   :  { %v2407_v27 = vperm.slane %v449_v24, 0  ;;  %v2426_v41 = vperm.slane %v450_v39, 0  ;;  %vm1650_vm3 = vcmask 523264  }
  0x14   :  { %v2431_v49 = vunpack.c.0.s8 %v564_v44 }
  0x18   :  { %76 = vperm.xlu2 %2043, %v71_v5  }
  0x1a   :  { %63 = vperm.xlu1 %2044, %v2342_v6   ;;  %57 = vperm.xlu0 %2042, %v2342_v6  }
  0x20   :  { %2046 = vset.pattern.permute.xlu2 %v2334_v3 }
  0x22   :  { %2045 = vset.pattern.permute.xlu1 %v2347_v7  ;;  %132 = vperm.xlu0 %2042, %v121_v8  }
  0x28   :  { %82 = vperm.xlu2 %2046, %v71_v5  }
  0x2a   :  { %69 = vperm.xlu1 %2045, %v2342_v6   ;;  %257 = vperm.xlu0 %2042, %v2355_v10  }
  0x30   :  { %2048 = vset.pattern.permute.xlu2 %v2347_v7 }
  0x32   :  { %2047 = vset.pattern.permute.xlu1 %v2331_v2  ;;  %432 = vperm.xlu0 %2042, %v2360_v11  }
  0x38   :  { %94 = vperm.xlu2 %2048, %v71_v5  }
  0x3a   :  { %88 = vperm.xlu1 %2047, %v71_v5   ;;  %2080 = vset.pattern.permute.xlu0 %v2327_v1 }
  0x40   :  { %2050 = vset.pattern.permute.xlu2 %v2331_v2 }
  0x42   :  { %2049 = vset.pattern.permute.xlu1 %v2334_v3  ;;  %51 = vperm.xlu0 %2080, %v2342_v6  }
  0x48   :  { %113 = vperm.xlu2 %2050, %v96_v12  }
  0x4a   :  { %107 = vperm.xlu1 %2049, %v96_v12   ;;  %101 = vperm.xlu0 %2080, %v96_v12  }
  0x50   :  { %2052 = vset.pattern.permute.xlu2 %v2327_v1 }
  0x52   :  { %2051 = vset.pattern.permute.xlu1 %v2347_v7  ;;  %226 = vperm.xlu0 %2080, %v2373_v13  }
  0x58   :  { %126 = vperm.xlu2 %2052, %v121_v8  }
  0x5a   :  { %119 = vperm.xlu1 %2051, %v96_v12   ;;  %351 = vperm.xlu0 %2080, %v2379_v14  }
  0x60   :  { %2054 = vset.pattern.permute.xlu2 %v2347_v7 }
  0x62   :  { %2053 = vset.pattern.permute.xlu1 %v2331_v2  ;;  %2083 = vset.pattern.permute.xlu0 %v2347_v7 }
  0x68   :  { %144 = vperm.xlu2 %2054, %v121_v8  }
  0x6a   :  { %138 = vperm.xlu1 %2053, %v121_v8   ;;  %194 = vperm.xlu0 %2083, %v171_v16  }
  0x70   :  { %2056 = vset.pattern.permute.xlu2 %v2334_v3 }
  0x72   :  { %2055 = vset.pattern.permute.xlu1 %v2327_v1  ;;  %v2387_v17 = vpop.permute.xlu2 %76  ;;  %319 = vperm.xlu0 %2083, %v2390_v18  }
  0x78   :  { %157 = vperm.xlu2 %2056, %v146_v15  }
  0x7a   :  { %151 = vperm.xlu1 %2055, %v146_v15   ;;  %369 = vperm.xlu0 %2083, %v2379_v14  }
  0x80   :  { %2058 = vset.pattern.permute.xlu2 %v2327_v1 }
  0x82   :  { %2057 = vset.pattern.permute.xlu1 %v2347_v7  ;;  %v83_v19 = vpop.permute.xlu2 %82  ;;  %2087 = vset.pattern.permute.xlu0 %v2331_v2 }
  0x83   :  { %v499_v40 = vmul.f32 %v2399_v21, %v83_v19 }
  0x85   :  { %v797_v42 = vrot.slane %v499_v40, 4 }
  0x88   :  { %176 = vperm.xlu2 %2058, %v171_v16  }
  0x8a   :  { %169 = vperm.xlu1 %2057, %v146_v15   ;;  %163 = vperm.xlu0 %2087, %v146_v15  }
  0x8c   :  { %v64_v25 = vpop.permute.xlu1 %63  ;;  %v58_v36 = vpop.permute.xlu0 %57 }
  0x8d   :  { %v496_v26 = vmul.f32 %v64_v25, %v2342_v6  ;;  %v495_v46 = vmul.f32 %v58_v36, %v2342_v6 }
  0x8f   :  { %v1009_v29 = vrot.slane %v496_v26, 4  ;;  %v785_v51 = vrot.slane %v495_v46, 4 }
  0x90   :  { %2060 = vset.pattern.permute.xlu2 %v2331_v2 }
  0x92   :  { %2059 = vset.pattern.permute.xlu1 %v2334_v3  ;;  %v95_v22 = vpop.permute.xlu2 %94 }
  0x93   :  { %v2403_v23 = vmul.f32 %v2399_v21, %v95_v22 }
  0x94   :  { %v133_v45 = vpop.permute.xlu0 %132 }
  0x95   :  { %v507_v47 = vmul.f32 %v2426_v41, %v133_v45  ;;  %v1245_v8 = vrot.slane %v2403_v23, 4 }
  0x97   :  { %v798_v48 = vsel %vm559_vm0, %v507_v47, %v797_v42  ;;  %v795_v52 = vrot.slane %v507_v47, 4 }
  0x98   :  { %188 = vperm.xlu2 %2060, %v171_v16   ;;  %v806_v53 = vperm.slane %v798_v48, %v2431_v49  ;;  %v271_v48 = vperm.slane %v2352_v9, 1 }
  0x99   :  { %v796_v58 = vsel %vm559_vm0, %v795_v52, %v499_v40 }
  0x9a   :  { %182 = vperm.xlu1 %2059, %v171_v16   ;;  %v843_v59 = vrot.slane %v806_v53, 4  ;;  %v802_v12 = vperm.slane %v796_v58, %v2431_v49  ;;  %288 = vperm.xlu0 %2087, %v271_v48  }
  0x9c   :  { %v70_v31 = vpop.permute.xlu1 %69  ;;  %v831_v25 = vrot.slane %v802_v12, 4 }
  0xa0   :  { %2062 = vset.pattern.permute.xlu2 %v2334_v3 }
  0xa2   :  { %v114_v28 = vpop.permute.xlu2 %113  ;;  %2061 = vset.pattern.permute.xlu1 %v2327_v1 }
  0xa3   :  { %v504_v30 = vmul.f32 %v2407_v27, %v114_v28  ;;  %v497_v28 = vmul.f32 %v70_v31, %v2342_v6 }
  0xa5   :  { %v1007_v33 = vrot.slane %v504_v30, 4  ;;  %v2414_v34 = vsel %vm559_vm0, %v504_v30, %v1009_v29  ;;  %v2465_v30 = vpop.permute.xlu0 %257  ;;  %v1233_v36 = vrot.slane %v497_v28, 4 }
  0xa6   :  { %3443 = vst [vmem:[#allocation11_spill] sm:$0xff] %v2465_v30 }
  0xa7   :  { %v2417_v35 = vsel %vm559_vm0, %v1007_v33, %v496_v26 }
  0xa8   :  { %207 = vperm.xlu2 %2062, %v196_v32  }
  0xaa   :  { %201 = vperm.xlu1 %2061, %v196_v32  }
  0xac   :  { %v89_v37 = vpop.permute.xlu1 %88 }
  0xad   :  { %v2420_v38 = vmul.f32 %v2399_v21, %v89_v37 }
  0xaf   :  { %v1021_v58 = vrot.slane %v2420_v38, 4 }
  0xb0   :  { %2064 = vset.pattern.permute.xlu2 %v2347_v7 }
  0xb2   :  { %2063 = vset.pattern.permute.xlu1 %v2331_v2  ;;  %v2433_v50 = vpop.permute.xlu2 %126 }
  0xb8   :  { %219 = vperm.xlu2 %2064, %v196_v32  }
  0xba   :  { %213 = vperm.xlu1 %2063, %v196_v32  }
  0xbc   :  { %v108_v54 = vpop.permute.xlu1 %107 }
  0xbd   :  { %v503_v55 = vmul.f32 %v2407_v27, %v108_v54  ;;  %v2486_v54 = vpop.permute.xlu0 %432 }
  0xbe   :  { %3444 = vst [vmem:[#allocation12_spill] sm:$0xff] %v2486_v54 }
  0xbf   :  { %v783_v56 = vrot.slane %v503_v55, 4  ;;  %v786_v57 = vsel %vm559_vm0, %v503_v55, %v785_v51 }
  0xc0   :  { %v794_v60 = vperm.slane %v786_v57, %v2431_v49  ;;  %2066 = vset.pattern.permute.xlu2 %v2331_v2 }
  0xc1   :  { %v784_v61 = vsel %vm559_vm0, %v783_v56, %v495_v46  ;;  %v1018_v56 = vperm.slane %v2414_v34, %v2431_v49 }
  0xc2   :  { %v790_v62 = vperm.slane %v784_v61, %v2431_v49  ;;  %v2444_v63 = vsel %vm559_vm0, %v843_v59, %v794_v60  ;;  %v845_v0 = vrot.slane %v794_v60, 4  ;;  %v145_v5 = vpop.permute.xlu2 %144  ;;  %2065 = vset.pattern.permute.xlu1 %v2334_v3  ;;  %v1014_v60 = vperm.slane %v2417_v35, %v2431_v49 }
  0xc3   :  { %v509_v15 = vmul.f32 %v2426_v41, %v145_v5  ;;  %v1069_v5 = vrot.slane %v1018_v56, 4 }
  0xc4   :  { %v833_v16 = vrot.slane %v790_v62, 4  ;;  %v2451_v19 = vsel %vm559_vm0, %v806_v53, %v845_v0  ;;  %v2462_v29 = vsel %vm559_vm0, %v831_v25, %v790_v62 }
  0xc5   :  { %v1243_v20 = vrot.slane %v509_v15, 4  ;;  %v1246_v22 = vsel %vm559_vm0, %v509_v15, %v1245_v8  ;;  %v2502_v8 = vpop.permute.xlu0 %51 }
  0xc6   :  { %v2455_v24 = vsel %vm559_vm0, %v802_v12, %v833_v16  ;;  %v1254_v32 = vperm.slane %v1246_v22, %v2431_v49  ;;  %v1057_v12 = vrot.slane %v1014_v60, 4 }
  0xc7   :  { %v1244_v26 = vsel %vm559_vm0, %v1243_v20, %v2403_v23 }
  0xc8   :  { %238 = vperm.xlu2 %2066, %v2373_v13   ;;  %v1250_v39 = vperm.slane %v1244_v26, %v2431_v49  ;;  %v1291_v42 = vrot.slane %v1254_v32, 4 }
  0xca   :  { %232 = vperm.xlu1 %2065, %v2373_v13   ;;  %v1279_v44 = vrot.slane %v1250_v39, 4 }
  0xcc   :  { %v120_v33 = vpop.permute.xlu1 %119 }
  0xcd   :  { %v505_v37 = vmul.f32 %v2407_v27, %v120_v33 }
  0xcf   :  { %v1231_v23 = vrot.slane %v505_v37, 4  ;;  %v1234_v40 = vsel %vm559_vm0, %v505_v37, %v1233_v36 }
  0xd0   :  { %v1242_v31 = vperm.slane %v1234_v40, %v2431_v49  ;;  %2068 = vset.pattern.permute.xlu2 %v2327_v1  ;;  %v451_v40 = vrot.slane %v2338_v4, 4 }
  0xd1   :  { %v1232_v43 = vsel %vm559_vm0, %v1231_v23, %v497_v28  ;;  %v102_v28 = vpop.permute.xlu0 %101 }
  0xd2   :  { %v1238_v45 = vperm.slane %v1232_v43, %v2431_v49  ;;  %v2476_v46 = vsel %vm559_vm0, %v1291_v42, %v1242_v31  ;;  %v1293_v47 = vrot.slane %v1242_v31, 4  ;;  %2067 = vset.pattern.permute.xlu1 %v2347_v7  ;;  %v2499_v61 = vpop.permute.xlu2 %157  ;;  %v2535_v42 = vperm.slane %v451_v40, 0 }
  0xd4   :  { %v1281_v51 = vrot.slane %v1238_v45, 4  ;;  %v2481_v52 = vsel %vm559_vm0, %v1279_v44, %v1238_v45  ;;  %v2484_v53 = vsel %vm559_vm0, %v1254_v32, %v1293_v47  ;;  %v452_v32 = vrot.slane %v2338_v4, 5 }
  0xd6   :  { %v2489_v55 = vsel %vm559_vm0, %v1250_v39, %v1281_v51  ;;  %v2528_v33 = vperm.slane %v452_v32, 0  ;;  %v453_v51 = vrot.slane %v2338_v4, 6 }
  0xd8   :  { %251 = vperm.xlu2 %2068, %v2355_v10  }
  0xd9   :  { %v2531_v37 = vpop.permute.xlu0 %226 }
  0xda   :  { %244 = vperm.xlu1 %2067, %v2373_v13  }
  0xdc   :  { %v139_v57 = vpop.permute.xlu1 %138 }
  0xdd   :  { %v508_v59 = vmul.f32 %v2426_v41, %v139_v57  ;;  %v2551_v57 = vperm.slane %v453_v51, 0 }
  0xdf   :  { %v1019_v62 = vrot.slane %v508_v59, 4  ;;  %v1022_v0 = vsel %vm559_vm0, %v508_v59, %v1021_v58 }
  0xe0   :  { %v1030_v13 = vperm.slane %v1022_v0, %v2431_v49  ;;  %2070 = vset.pattern.permute.xlu2 %v2347_v7 }
  0xe1   :  { %v1020_v34 = vsel %vm559_vm0, %v1019_v62, %v2420_v38  ;;  %v2537_v43 = vpop.permute.xlu0 %351 }
  0xe2   :  { %v1026_v15 = vperm.slane %v1020_v34, %v2431_v49  ;;  %v1067_v16 = vrot.slane %v1030_v13, 4  ;;  %v2510_v35 = vsel %vm559_vm0, %v1030_v13, %v1069_v5  ;;  %2069 = vset.pattern.permute.xlu1 %v2331_v2  ;;  %v2523_v38 = vpop.permute.xlu2 %176  ;;  %3445 = vst [vmem:[#allocation13_spill] sm:$0xff] %v2537_v43  ;;  %v454_v34 = vrot.slane %v2338_v4, 7 }
  0xe3   :  { %v2580_v4 = vperm.slane %v2352_v9, 3 }
  0xe4   :  { %v1055_v20 = vrot.slane %v1026_v15, 4  ;;  %v2514_v22 = vsel %vm559_vm0, %v1026_v15, %v1057_v12  ;;  %v2517_v25 = vsel %vm559_vm0, %v1067_v16, %v1018_v56  ;;  %v2569_v12 = vperm.slane %v454_v34, 0 }
  0xe5   :  { %v2572_v15 = vperm.slane %v2352_v9, 5 }
  0xe6   :  { %v2520_v26 = vsel %vm559_vm0, %v1055_v20, %v1014_v60 }
  0xe7   :  { %388 = vperm.xlu0 %2087, %v2572_v15  }
  0xe8   :  { %269 = vperm.xlu2 %2070, %v2355_v10  }
  0xe9   :  { %v2542_v45 = vpop.permute.xlu0 %194 }
  0xea   :  { %263 = vperm.xlu1 %2069, %v2355_v10  }
  0xec   :  { %v152_v23 = vpop.permute.xlu1 %151 }
  0xef   :  { %2210 = vset.pattern.permute.xlu0 %v2347_v7 }
  0xf0   :  { %2072 = vset.pattern.permute.xlu2 %v2334_v3 }
  0xf1   :  { %v2549_v56 = vpop.permute.xlu0 %319 }
  0xf2   :  { %2071 = vset.pattern.permute.xlu1 %v2327_v1  ;;  %v189_v36 = vpop.permute.xlu2 %188 }
  0xf3   :  { %v516_v39 = vmul.f32 %v2528_v33, %v189_v36 }
  0xf5   :  { %v1045_v20 = vrot.slane %v516_v39, 4 }
  0xf8   :  { %282 = vperm.xlu2 %2072, %v271_v48  }
  0xf9   :  { %v2563_v5 = vpop.permute.xlu0 %369 }
  0xfa   :  { %276 = vperm.xlu1 %2071, %v271_v48   ;;  %3446 = vst [vmem:[#allocation14_spill] sm:$0xff] %v2563_v5 }
  0xfc   :  { %v170_v31 = vpop.permute.xlu1 %169 }
  0xfd   :  { %v513_v44 = vmul.f32 %v2535_v42, %v170_v31  ;;  %v506_v31 = vmul.f32 %v2426_v41, %v2433_v50  ;;  %v510_v50 = vmul.f32 %v2535_v42, %v152_v23 }
  0xff   :  { %v1257_v59 = vrot.slane %v513_v44, 4 }
 0x100   :  { %2074 = vset.pattern.permute.xlu2 %v2327_v1 }
 0x101   :  { %v164_v40 = vpop.permute.xlu0 %163 }
 0x102   :  { %2073 = vset.pattern.permute.xlu1 %v2347_v7  ;;  %v2545_v47 = vpop.permute.xlu2 %207 }
 0x108   :  { %301 = vperm.xlu2 %2074, %v2390_v18  }
 0x10a   :  { %294 = vperm.xlu1 %2073, %v271_v48  }
 0x10c   :  { %v2565_v13 = vpop.permute.xlu1 %182 }
 0x110   :  { %2076 = vset.pattern.permute.xlu2 %v2331_v2 }
 0x112   :  { %v220_v58 = vpop.permute.xlu2 %219  ;;  %2075 = vset.pattern.permute.xlu1 %v2334_v3 }
 0x113   :  { %v521_v60 = vmul.f32 %v2551_v57, %v220_v58 }
 0x115   :  { %v1255_v62 = vrot.slane %v521_v60, 4  ;;  %v2556_v0 = vsel %vm559_vm0, %v521_v60, %v1257_v59  ;;  %v494_v59 = vmul.f32 %v2502_v8, %v2342_v6 }
 0x117   :  { %v2559_v48 = vsel %vm559_vm0, %v1255_v62, %v513_v44  ;;  %v502_v44 = vmul.f32 %v2407_v27, %v102_v28  ;;  %v2295_v62 = vmov 1934713408   ;;  %v561_v27 = vrot.slane %v494_v59, 4 }
 0x118   :  { %313 = vperm.xlu2 %2076, %v2390_v18   ;;  %v612_v34 = vunpack.c.l.s4 %v2295_v62 }
 0x119   :  { %v558_v5 = vrot.slane %v502_v44, 4 }
 0x11a   :  { %307 = vperm.xlu1 %2075, %v2390_v18   ;;  %v498_v18 = vmul.f32 %v2399_v21, %v2387_v17  ;;  %v512_v17 = vmul.f32 %v2535_v42, %v164_v40 }
 0x11b   :  { %v560_v23 = vsel %vm559_vm0, %v558_v5, %v494_v59  ;;  %v511_v5 = vmul.f32 %v2535_v42, %v2499_v61 }
 0x11c   :  { %v202_v36 = vpop.permute.xlu1 %201  ;;  %v573_v21 = vrot.slane %v498_v18, 4  ;;  %v1033_v8 = vrot.slane %v512_v17, 4  ;;  %v2618_v43 = vperm.slane %v560_v23, %v2431_v49 }
 0x11d   :  { %v518_v6 = vmul.f32 %v2551_v57, %v202_v36 }
 0x11e   :  { %v574_v41 = vsel %vm559_vm0, %v506_v31, %v573_v21  ;;  %v522_v21 = vmul.f32 %v2569_v12, %v2531_v37 }
 0x120   :  { %2078 = vset.pattern.permute.xlu2 %v2334_v3 }
 0x122   :  { %v239_v16 = vpop.permute.xlu2 %238  ;;  %2077 = vset.pattern.permute.xlu1 %v2327_v1 }
 0x123   :  { %v524_v32 = vmul.f32 %v2569_v12, %v239_v16  ;;  %v571_v16 = vrot.slane %v506_v31, 4  ;;  %v2606_v31 = vperm.slane %v574_v41, %v2431_v49 }
 0x125   :  { %v1043_v51 = vrot.slane %v524_v32, 4  ;;  %v1046_v58 = vsel %vm559_vm0, %v524_v32, %v1045_v20  ;;  %v2598_v20 = vperm.slane %v2352_v9, 6  ;;  %v2600_v32 = vunpack.c.0.s8 %v612_v34 }
 0x126   :  { %v1054_v28 = vperm.slane %v1046_v58, %v2431_v49  ;;  %v2603_v40 = vsel %vm559_vm0, %v571_v16, %v498_v18  ;;  %v514_v58 = vmul.f32 %v2528_v33, %v2523_v38  ;;  %v585_v34 = vrot.slane %v510_v50, 4 }
 0x127   :  { %v1044_v60 = vsel %vm559_vm0, %v1043_v51, %v516_v39  ;;  %v562_v51 = vsel %vm559_vm0, %v502_v44, %v561_v27  ;;  %v583_v18 = vrot.slane %v518_v6, 4  ;;  %v519_v38 = vmul.f32 %v2551_v57, %v2545_v47 }
 0x128   :  { %332 = vperm.xlu2 %2078, %v2580_v4   ;;  %v1050_v62 = vperm.slane %v1044_v60, %v2431_v49  ;;  %v1091_v44 = vrot.slane %v1054_v28, 4  ;;  %v586_v37 = vsel %vm559_vm0, %v518_v6, %v585_v34  ;;  %v1078_v27 = vperm.slane %v2510_v35, %v2600_v32 }
 0x129   :  { %v597_v42 = vrot.slane %v514_v58, 4  ;;  %v584_v47 = vsel %vm559_vm0, %v583_v18, %v510_v50  ;;  %v809_v50 = vrot.slane %v511_v5, 4  ;;  %v807_v18 = vrot.slane %v519_v38, 4 }
 0x12a   :  { %326 = vperm.xlu1 %2077, %v2580_v4  }
 0x12b   :  { %v810_v54 = vsel %vm559_vm0, %v519_v38, %v809_v50  ;;  %v2680_v50 = vperm.slane %v2603_v40, %v2431_v49 }
 0x12c   :  { %v214_v39 = vpop.permute.xlu1 %213 }
 0x12d   :  { %v520_v36 = vmul.f32 %v2551_v57, %v214_v39  ;;  %v1066_v57 = vperm.slane %v2514_v22, %v2600_v32  ;;  %v2649_v22 = vperm.slane %v584_v47, %v2431_v49 }
 0x12f   :  { %v1031_v16 = vrot.slane %v520_v36, 4  ;;  %v1034_v41 = vsel %vm559_vm0, %v520_v36, %v1033_v8  ;;  %v1079_v8 = vrot.slane %v1050_v62, 4  ;;  %v595_v36 = vrot.slane %v522_v21, 4 }
 0x130   :  { %v1042_v59 = vperm.slane %v1034_v41, %v2431_v49  ;;  %407 = vperm.xlu2 %2078, %v2598_v20   ;;  %v570_v41 = vperm.slane %v562_v51, %v2431_v49  ;;  %v609_v51 = vrot.slane %v2618_v43, 4 }
 0x131   :  { %v1032_v60 = vsel %vm559_vm0, %v1031_v16, %v512_v17  ;;  %v2639_v17 = vperm.slane %v586_v37, %v2431_v49  ;;  %v619_v16 = vrot.slane %v2606_v31, 4 }
 0x132   :  { %v1038_v39 = vperm.slane %v1032_v60, %v2431_v49  ;;  %v1093_v23 = vrot.slane %v1042_v59, 4  ;;  %2079 = vset.pattern.permute.xlu1 %v2331_v2  ;;  %v2633_v61 = vsel %vm559_vm0, %v1091_v44, %v1042_v59  ;;  %v1117_v59 = vrot.slane %v1078_v27, 4 }
 0x133   :  { %v598_v60 = vsel %vm559_vm0, %v522_v21, %v597_v42  ;;  %v515_v21 = vmul.f32 %v2528_v33, %v2565_v13  ;;  %v620_v38 = vsel %vm559_vm0, %v619_v16, %v570_v41 }
 0x134   :  { %v1081_v35 = vrot.slane %v1038_v39, 4  ;;  %v2642_v6 = vsel %vm559_vm0, %v1079_v8, %v1038_v39  ;;  %v1094_v34 = vsel %vm559_vm0, %v1054_v28, %v1093_v23  ;;  %v1109_v39 = vrot.slane %v1066_v57, 4 }
 0x135   :  { %v1102_v44 = vperm.slane %v1094_v34, %v2600_v32  ;;  %v596_v23 = vsel %vm559_vm0, %v595_v36, %v514_v58  ;;  %v645_v34 = vrot.slane %v2639_v17, 4  ;;  %v633_v58 = vrot.slane %v2649_v22, 4 }
 0x136   :  { %v1082_v37 = vsel %vm559_vm0, %v1050_v62, %v1081_v35  ;;  %v808_v35 = vsel %vm559_vm0, %v807_v18, %v511_v5  ;;  %v818_v5 = vperm.slane %v810_v54, %v2431_v49  ;;  %v2684_v18 = vperm.slane %v596_v23, %v2431_v49 }
 0x137   :  { %v1090_v8 = vperm.slane %v1082_v37, %v2600_v32  ;;  %v2655_v28 = vsel %vm559_vm0, %v1102_v44, %v1117_v59  ;;  %v1115_v47 = vrot.slane %v1102_v44, 4  ;;  %v606_v59 = vperm.slane %v598_v60, %v2431_v49 }
 0x138   :  { %2082 = vset.pattern.permute.xlu2 %v2327_v1  ;;  %v621_v44 = vrot.slane %v570_v41, 4  ;;  %v821_v16 = vrot.slane %v515_v21, 4  ;;  %v634_v40 = vsel %vm559_vm0, %v2684_v18, %v633_v58  ;;  %v2696_v54 = vperm.slane %v620_v38, %v2600_v32 }
 0x139   :  { %v2665_v62 = vsel %vm559_vm0, %v1090_v8, %v1109_v39  ;;  %v1107_v42 = vrot.slane %v1090_v8, 4  ;;  %v2672_v36 = vsel %vm559_vm0, %v1115_v47, %v1078_v27  ;;  %v646_v60 = vsel %vm559_vm0, %v606_v59, %v645_v34 }
 0x13a   :  { %338 = vperm.xlu1 %2079, %v2580_v4   ;;  %v2688_v27 = vperm.slane %v808_v35, %v2431_v49  ;;  %3447 = vst [vmem:[#allocation15_spill] sm:$0xff] %v2696_v54  ;;  %v2700_v8 = vperm.slane %v2444_v63, %v2600_v32  ;;  %v622_v34 = vsel %vm559_vm0, %v2606_v31, %v621_v44 }
 0x13b   :  { %v2676_v13 = vsel %vm559_vm0, %v1107_v42, %v1066_v57  ;;  %v610_v57 = vsel %vm559_vm0, %v2680_v50, %v609_v51  ;;  %v654_v47 = vperm.slane %v646_v60, %v2600_v32  ;;  %v869_v42 = vrot.slane %v818_v5, 4 }
 0x13c   :  { %v233_v37 = vpop.permute.xlu1 %232  ;;  %3448 = vst [vmem:[#allocation16_spill] sm:$0xff] %v2700_v8  ;;  %v643_v51 = vrot.slane %v606_v59, 4  ;;  %v854_v58 = vperm.slane %v2451_v19, %v2600_v32  ;;  %v857_v63 = vrot.slane %v2688_v27, 4  ;;  %v630_v19 = vperm.slane %v622_v34, %v2600_v32 }
 0x13d   :  { %v523_v41 = vmul.f32 %v2569_v12, %v233_v37  ;;  %v618_v37 = vperm.slane %v610_v57, %v2600_v32  ;;  %v842_v57 = vperm.slane %v2455_v24, %v2600_v32 }
 0x13e   :  { %v644_v60 = vsel %vm559_vm0, %v643_v51, %v2639_v17  ;;  %v889_v51 = vrot.slane %v2700_v8, 4 }
 0x13f   :  { %v819_v39 = vrot.slane %v523_v41, 4  ;;  %v822_v23 = vsel %vm559_vm0, %v523_v41, %v821_v16  ;;  %v642_v16 = vperm.slane %v634_v40, %v2600_v32  ;;  %v667_v41 = vrot.slane %v654_v47, 4 }
 0x140   :  { %v830_v35 = vperm.slane %v822_v23, %v2431_v49  ;;  %401 = vperm.xlu2 %2082, %v2598_v20   ;;  %v2731_v17 = vperm.slane %v644_v60, %v2600_v32  ;;  %v661_v24 = vrot.slane %v618_v37, 4  ;;  %v885_v60 = vrot.slane %v842_v57, 4 }
 0x141   :  { %v820_v38 = vsel %vm559_vm0, %v819_v39, %v515_v21  ;;  %v665_v39 = vrot.slane %v2696_v54, 4  ;;  %v669_v54 = vrot.slane %v630_v19, 4 }
 0x142   :  { %v2715_v31 = vperm.slane %v820_v38, %v2431_v49  ;;  %v867_v44 = vrot.slane %v830_v35, 4  ;;  %v870_v59 = vsel %vm559_vm0, %v830_v35, %v869_v42  ;;  %2081 = vset.pattern.permute.xlu1 %v2334_v3  ;;  %v659_v3 = vrot.slane %v642_v16, 4  ;;  %3449 = vst [vmem:[#allocation17_spill] sm:$0xff] %v2731_v17 }
 0x143   :  { %v878_v21 = vperm.slane %v870_v59, %v2600_v32  ;;  %v893_v38 = vrot.slane %v854_v58, 4  ;;  %v668_v59 = vsel %vm559_vm0, %v667_v41, %v630_v19  ;;  %v2766_v19 = vsel %vm559_vm0, %v654_v47, %v669_v54 }
 0x144   :  { %v858_v40 = vsel %vm559_vm0, %v2715_v31, %v857_v63  ;;  %v868_v23 = vsel %vm559_vm0, %v867_v44, %v818_v5  ;;  %v517_v63 = vmul.f32 %v2528_v33, %v2542_v45  ;;  %v2746_v8 = vsel %vm559_vm0, %v659_v3, %v618_v37  ;;  %v2778_v3 = vpop.permute.xlu2 %251 }
 0x145   :  { %v891_v42 = vrot.slane %v878_v21, 4  ;;  %v866_v35 = vperm.slane %v858_v40, %v2600_v32  ;;  %v2734_v34 = vperm.slane %v868_v23, %v2600_v32  ;;  %v2743_v23 = vsel %vm559_vm0, %v878_v21, %v893_v38 }
 0x146   :  { %v2753_v33 = vsel %vm559_vm0, %v2731_v17, %v665_v39  ;;  %v1269_v41 = vrot.slane %v517_v63, 4  ;;  %v2769_v21 = vsel %vm559_vm0, %v642_v16, %v661_v24  ;;  %v2785_v16 = vperm.slane %v2481_v52, %v2600_v32 }
 0x147   :  { %3450 = vst [vmem:[#allocation18_spill] sm:$0xff] %v2734_v34  ;;  %v892_v5 = vsel %vm559_vm0, %v891_v42, %v854_v58  ;;  %v883_v44 = vrot.slane %v866_v35, 4  ;;  %v2757_v45 = vsel %vm559_vm0, %v2734_v34, %v889_v51  ;;  %v1266_v42 = vperm.slane %v2556_v0, %v2431_v49 }
 0x148   :  { %426 = vperm.xlu2 %2082, %v2360_v11   ;;  %v2110_v40 = vpack.i.bf16 %v668_v59, %v892_v5  ;;  %3451 = vst [vmem:[#allocation19_spill] sm:$0xff] %v2785_v16  ;;  %v1262_v24 = vperm.slane %v2559_v48, %v2431_v49  ;;  %v1302_v0 = vperm.slane %v2484_v53, %v2600_v32 }
 0x149   :  { %v2749_v30 = vsel %vm559_vm0, %v883_v44, %v842_v57  ;;  %v2772_v57 = vsel %vm559_vm0, %v866_v35, %v885_v60  ;;  %v2789_v35 = vperm.slane %v2476_v46, %v2600_v32  ;;  %v2800_v52 = vperm.slane %v2517_v25, %v2600_v32 }
 0x14a   :  { %357 = vperm.xlu1 %2081, %v2379_v14   ;;  %2111 = vrot.lane.b32.xlu0 %v2110_v40, %s2296_s0  ;;  %v2095_v58 = vpack.i.bf16 %v2746_v8, %v2749_v30  ;;  %v1317_v5 = vrot.slane %v1266_v42, 4  ;;  %v2807_v53 = vperm.slane %v2520_v26, %v2600_v32  ;;  %v1329_v44 = vrot.slane %v2785_v16, 4 }
 0x14b   :  { %3452 = vst [vmem:[#allocation20_spill] sm:$0xff] %v2789_v35  ;;  %v1337_v40 = vrot.slane %v2789_v35, 4  ;;  %v2819_v39 = vperm.slane %v2633_v61, %v2600_v32  ;;  %v3460_v30 = vpack.i.bf16 %v2753_v33, %v2757_v45 }
 0x14c   :  { %v245_v51 = vpop.permute.xlu1 %244  ;;  %3453 = vst [vmem:[#allocation21_spill] sm:$0xff] %v2800_v52  ;;  %v2830_v37 = vpop.permute.xlu2 %269 }
 0x14d   :  { %v525_v47 = vmul.f32 %v2569_v12, %v245_v51  ;;  %v1290_v12 = vperm.slane %v2489_v55, %v2600_v32  ;;  %3454 = vst [vmem:[#allocation22_spill] sm:$0xff] %v2807_v53  ;;  %v1305_v55 = vrot.slane %v1262_v24, 4 }
 0x14e   :  { %3455 = vst [vmem:[#allocation23_spill] sm:$0xff] %v2819_v39 }
 0x14f   :  { %v1267_v38 = vrot.slane %v525_v47, 4  ;;  %v1270_v59 = vsel %vm559_vm0, %v525_v47, %v1269_v41  ;;  %v1333_v51 = vrot.slane %v1290_v12, 4 }
 0x150   :  { %v1278_v46 = vperm.slane %v1270_v59, %v2431_v49  ;;  %2085 = vset.pattern.permute.xlu2 %v2347_v7 }
 0x151   :  { %v1268_v48 = vsel %vm559_vm0, %v1267_v38, %v517_v63  ;;  %v1341_v63 = vrot.slane %v1302_v0, 4  ;;  %v1113_v38 = vrot.slane %v2800_v52, 4 }
 0x152   :  { %v1274_v60 = vperm.slane %v1268_v48, %v2431_v49  ;;  %v1315_v25 = vrot.slane %v1278_v46, 4  ;;  %382 = vperm.xlu1 %2081, %v2572_v15   ;;  %v1318_v41 = vsel %vm559_vm0, %v1278_v46, %v1317_v5  ;;  %v2825_v5 = vperm.slane %v2642_v6, %v2600_v32 }
 0x153   :  { %v1326_v47 = vperm.slane %v1318_v41, %v2600_v32 }
 0x154   :  { %v1303_v26 = vrot.slane %v1274_v60, 4  ;;  %v1306_v59 = vsel %vm559_vm0, %v1274_v60, %v1305_v55  ;;  %v1316_v48 = vsel %vm559_vm0, %v1315_v25, %v1266_v42  ;;  %3456 = vst [vmem:[#allocation24_spill] sm:$0xff] %v2825_v5  ;;  %v1105_v55 = vrot.slane %v2807_v53, 4 }
 0x155   :  { %v1314_v54 = vperm.slane %v1306_v59, %v2600_v32  ;;  %v2828_v46 = vsel %vm559_vm0, %v1326_v47, %v1341_v63  ;;  %v1339_v41 = vrot.slane %v1326_v47, 4  ;;  %v2837_v42 = vperm.slane %v1316_v48, %v2600_v32 }
 0x156   :  { %v1304_v60 = vsel %vm559_vm0, %v1303_v26, %v1262_v24  ;;  %v2855_v59 = vsel %vm559_vm0, %v2819_v39, %v1113_v38  ;;  %v2879_v38 = vpop.permute.xlu2 %282 }
 0x157   :  { %3457 = vst [vmem:[#allocation25_spill] sm:$0xff] %v2837_v42  ;;  %v2840_v25 = vsel %vm559_vm0, %v1314_v54, %v1333_v51  ;;  %v1331_v6 = vrot.slane %v1314_v54, 4  ;;  %v2843_v63 = vperm.slane %v1304_v60, %v2600_v32  ;;  %v2846_v47 = vsel %vm559_vm0, %v1339_v41, %v1302_v0 }
 0x158   :  { %344 = vperm.xlu2 %2085, %v2580_v4   ;;  %v2859_v54 = vsel %vm559_vm0, %v2837_v42, %v1337_v40  ;;  %v2866_v4 = vsel %vm559_vm0, %v2825_v5, %v1105_v55  ;;  %v2211_v40 = vld [vmem:[#allocation2 + $0x8] sm:$0xff] }
 0x159   :  { %3458 = vst [vmem:[#allocation26_spill] sm:$0xff] %v2843_v63  ;;  %v2862_v51 = vsel %vm559_vm0, %v1331_v6, %v1290_v12  ;;  %v2870_v0 = vsel %vm559_vm0, %v2843_v63, %v1329_v44 }
 0x15a   :  { %2084 = vset.pattern.permute.xlu1 %v2327_v1  ;;  %v456_v1 = vrot.slane %v2352_v9, 2 }
 0x15c   :  { %v264_v41 = vpop.permute.xlu1 %263  ;;  %v2890_v60 = vperm.slane %v456_v1, 0  ;;  %v607_v1 = vrot.slane %v2680_v50, 4 }
 0x15d   :  { %v528_v55 = vmul.f32 %v264_v41, %v2355_v10  ;;  %v855_v41 = vrot.slane %v2715_v31, 4 }
 0x15f   :  { %v1121_v48 = vrot.slane %v528_v55, 4 }
 0x160   :  { %444 = vperm.xlu2 %2085, %v2360_v11  }
 0x162   :  { %376 = vperm.xlu1 %2084, %v2572_v15   ;;  %v2884_v44 = vpop.permute.xlu2 %301 }
 0x168   :  { %394 = vperm.xlu2 %2085, %v2572_v15  }
 0x16a   :  { %2086 = vset.pattern.permute.xlu1 %v2347_v7 }
 0x16c   :  { %v2941_v45 = vpop.permute.xlu1 %276 }
 0x170   :  { %2089 = vset.pattern.permute.xlu2 %v2331_v2 }
 0x172   :  { %v314_v6 = vpop.permute.xlu2 %313  ;;  %419 = vperm.xlu1 %2086, %v2598_v20  }
 0x173   :  { %v536_v26 = vmul.f32 %v2890_v60, %v314_v6 }
 0x175   :  { %v1119_v15 = vrot.slane %v536_v26, 4  ;;  %v2895_v61 = vsel %vm559_vm0, %v536_v26, %v1121_v48  ;;  %v631_v26 = vrot.slane %v2684_v18, 4  ;;  %v608_v48 = vsel %vm559_vm0, %v607_v1, %v2618_v43 }
 0x176   :  { %v2925_v50 = vperm.slane %v608_v48, %v2600_v32  ;;  %v529_v1 = vmul.f32 %v2830_v37, %v2355_v10 }
 0x177   :  { %v2898_v7 = vsel %vm559_vm0, %v1119_v15, %v528_v55  ;;  %v3462_v15 = vpack.i.bf16 %v2766_v19, %v2743_v23 }
 0x178   :  { %363 = vperm.xlu2 %2089, %v2379_v14   ;;  %v856_v14 = vsel %vm559_vm0, %v855_v41, %v2688_v27  ;;  %v657_v8 = vrot.slane %v2925_v50, 4 }
 0x179   :  { %v2928_v43 = vperm.slane %v856_v14, %v2600_v32  ;;  %v1345_v14 = vrot.slane %v529_v1, 4 }
 0x17a   :  { %2088 = vset.pattern.permute.xlu1 %v2331_v2  ;;  %v2916_v2 = vperm.slane %v2462_v29, %v2600_v32 }
 0x17c   :  { %3459 = vst [vmem:[#allocation27_spill] sm:$0xff] %v2916_v2  ;;  %v881_v18 = vrot.slane %v2916_v2, 4  ;;  %v295_v55 = vpop.permute.xlu1 %294 }
 0x17e   :  { %v882_v31 = vsel %vm559_vm0, %v2928_v43, %v881_v18 }
 0x180   :  { %2096 = vrot.lane.b32.xlu2 %v2095_v58, %s2296_s0  ;;  %v3461_v58 = vpack.i.bf16 %v2769_v21, %v2772_v57  ;;  %v455_v21 = vrot.slane %v2352_v9, 1  ;;  %v457_v57 = vrot.slane %v2352_v9, 3 }
 0x182   :  { %413 = vperm.xlu1 %2088, %v2598_v20   ;;  %v632_v20 = vsel %vm559_vm0, %v631_v26, %v2649_v22  ;;  %v333_v27 = vpop.permute.xlu2 %332  ;;  %v537_v26 = vmul.f32 %v2890_v60, %v2549_v56  ;;  %v2961_v18 = vperm.slane %v455_v21, 0  ;;  %v2963_v23 = vperm.slane %v457_v57, 0 }
 0x183   :  { %v2932_v29 = vperm.slane %v632_v20, %v2600_v32 }
 0x184   :  { %v1346_v19 = vsel %vm559_vm0, %v537_v26, %v1345_v14  ;;  %v533_v37 = vmul.f32 %v2961_v18, %v295_v55  ;;  %v539_v56 = vmul.f32 %v2963_v23, %v333_v27  ;;  %v460_v55 = vrot.slane %v2352_v9, 6 }
 0x185   :  { %v658_v22 = vsel %vm559_vm0, %v2932_v29, %v657_v8 }
 0x186   :  { %v2090_v33 = vpack.i.bf16 %v658_v22, %v882_v31  ;;  %v3463_v22 = vld [vmem:[#allocation11_spill] sm:$0xff]  ;;  %v1357_v57 = vrot.slane %v533_v37, 4  ;;  %v907_v27 = vrot.slane %v539_v56, 4  ;;  %v2993_v53 = vperm.slane %v460_v55, 0 }
 0x188   :  { %2106 = vrot.lane.b32.xlu2 %v3460_v30, %s2297_s1  ;;  %v1343_v30 = vrot.slane %v537_v26, 4  ;;  %v461_v26 = vrot.slane %v2352_v9, 7 }
 0x18a   :  { %438 = vperm.xlu1 %2088, %v2360_v11   ;;  %v408_v11 = vpop.permute.xlu2 %407  ;;  %v1344_v8 = vsel %vm559_vm0, %v1343_v30, %v529_v1 }
 0x18b   :  { %v1350_v21 = vperm.slane %v1344_v8, %v2431_v49 }
 0x18c   :  { %v308_v41 = vpop.permute.xlu1 %307 }
 0x18d   :  { %v535_v31 = vmul.f32 %v2890_v60, %v308_v41  ;;  %v1393_v35 = vrot.slane %v1350_v21, 4 }
 0x18f   :  { %v895_v14 = vrot.slane %v535_v31, 4 }
 0x192   :  { %2091 = vrot.lane.b32.xlu1 %v2090_v33, %s2297_s1  ;;  %v527_v33 = vmul.f32 %v3463_v22, %v2355_v10 }
 0x194   :  { %v897_v22 = vrot.slane %v527_v33, 4 }
 0x196   :  { %v898_v9 = vsel %vm559_vm0, %v535_v31, %v897_v22 }
 0x19a   :  { %2101 = vrot.lane.b32.xlu1 %v3461_v58, %s2298_s21  ;;  %v2947_v6 = vpop.permute.xlu2 %401  ;;  %v1354_v58 = vperm.slane %v1346_v19, %v2431_v49  ;;  %v458_v19 = vrot.slane %v2211_v40, 4 }
 0x19c   :  { %v327_v20 = vpop.permute.xlu1 %326  ;;  %v1405_v24 = vrot.slane %v1354_v58, 4  ;;  %v2995_v5 = vperm.slane %v458_v19, 0 }
 0x1a2   :  { %2116 = vrot.lane.b32.xlu1 %v3462_v15, %s2298_s21  ;;  %v2957_v48 = vpop.permute.xlu2 %426 }
 0x1ac   :  { %v2977_v1 = vpop.permute.xlu1 %338 }
 0x1b2   :  { %v345_v15 = vpop.permute.xlu2 %344 }
 0x1b3   :  { %v541_v12 = vmul.f32 %v2963_v23, %v345_v15  ;;  %v531_v15 = vmul.f32 %v2961_v18, %v2879_v38 }
 0x1b5   :  { %v1355_v41 = vrot.slane %v541_v12, 4  ;;  %v1358_v30 = vsel %vm559_vm0, %v541_v12, %v1357_v57  ;;  %v2989_v12 = vperm.slane %v461_v26, 0  ;;  %v908_v57 = vsel %vm559_vm0, %v907_v27, %v531_v15 }
 0x1b6   :  { %v1366_v8 = vperm.slane %v1358_v30, %v2431_v49  ;;  %v896_v30 = vsel %vm559_vm0, %v895_v14, %v527_v33  ;;  %v909_v31 = vrot.slane %v531_v15, 4  ;;  %v551_v26 = vmul.f32 %v2993_v53, %v408_v11  ;;  %v3467_v11 = vld [vmem:[#allocation13_spill] sm:$0xff] }
 0x1b7   :  { %v1356_v52 = vsel %vm559_vm0, %v1355_v41, %v533_v37  ;;  %v914_v27 = vperm.slane %v908_v57, %v2431_v49  ;;  %v902_v33 = vperm.slane %v896_v30, %v2431_v49  ;;  %v3466_v41 = vld [vmem:[#allocation12_spill] sm:$0xff]  ;;  %v3018_v19 = vmul.f32 %v2995_v5, %v3467_v11 }
 0x1b8   :  { %v1362_v39 = vperm.slane %v1356_v52, %v2431_v49  ;;  %v1403_v42 = vrot.slane %v1366_v8, 4  ;;  %v2987_v16 = vsel %vm559_vm0, %v1366_v8, %v1405_v24  ;;  %v906_v24 = vperm.slane %v898_v9, %v2431_v49 }
 0x1b9   :  { %3464 = vst [vmem:[#allocation11_spill] sm:$0xff] %v2987_v16  ;;  %v555_v22 = vmul.f32 %v2989_v12, %v3466_v41  ;;  %v526_v8 = vmul.f32 %v2778_v3, %v2355_v10  ;;  %v919_v15 = vrot.slane %v551_v26, 4  ;;  %v538_v57 = vmul.f32 %v2963_v23, %v327_v20  ;;  %v1728_v16 = vld [vmem:[#allocation5 + $0xf0] sm:$0xff] }
 0x1ba   :  { %v1391_v38 = vrot.slane %v1362_v39, 4  ;;  %v2998_v37 = vsel %vm559_vm0, %v1362_v39, %v1393_v35  ;;  %v3001_v52 = vsel %vm559_vm0, %v1403_v42, %v1354_v58  ;;  %v534_v39 = vmul.f32 %v2890_v60, %v2884_v44 }
 0x1bb   :  { %3465 = vst [vmem:[#allocation28_spill] sm:$0xff] %v2998_v37  ;;  %v910_v35 = vsel %vm559_vm0, %v539_v56, %v909_v31  ;;  %v459_v42 = vrot.slane %v2211_v40, 5  ;;  %v943_v60 = vrot.slane %v914_v27, 4  ;;  %v945_v56 = vrot.slane %v902_v33, 4 }
 0x1bc   :  { %v358_v55 = vpop.permute.xlu1 %357  ;;  %v3008_v14 = vsel %vm559_vm0, %v1391_v38, %v1350_v21  ;;  %v957_v21 = vrot.slane %v906_v24, 4  ;;  %v918_v44 = vperm.slane %v910_v35, %v2431_v49  ;;  %v671_v40 = vrot.slane %v534_v39, 4 }
 0x1bd   :  { %v543_v58 = vmul.f32 %v2995_v5, %v358_v55  ;;  %v3024_v30 = vperm.slane %v459_v42, 0  ;;  %v931_v31 = vrot.slane %v555_v22, 4  ;;  %v944_v55 = vsel %vm559_vm0, %v943_v60, %v902_v33 }
 0x1be   :  { %v697_v41 = vrot.slane %v3018_v19, 4  ;;  %v673_v10 = vrot.slane %v526_v8, 4  ;;  %v958_v11 = vsel %vm559_vm0, %v918_v44, %v957_v21  ;;  %v530_v35 = vmul.f32 %v2961_v18, %v2941_v45 }
 0x1bf   :  { %v921_v9 = vrot.slane %v543_v58, 4  ;;  %v920_v38 = vsel %vm559_vm0, %v919_v15, %v543_v58  ;;  %v955_v63 = vrot.slane %v918_v44, 4  ;;  %v946_v34 = vsel %vm559_vm0, %v914_v27, %v945_v56 }
 0x1c0   :  { %v926_v20 = vperm.slane %v920_v38, %v2431_v49  ;;  %v672_v58 = vsel %vm559_vm0, %v671_v40, %v526_v8  ;;  %v683_v15 = vrot.slane %v538_v57, 4  ;;  %v950_v60 = vperm.slane %v944_v55, %v2600_v32 }
 0x1c1   :  { %v922_v3 = vsel %vm559_vm0, %v551_v26, %v921_v9  ;;  %v674_v26 = vsel %vm559_vm0, %v534_v39, %v673_v10  ;;  %v956_v21 = vsel %vm559_vm0, %v955_v63, %v906_v24  ;;  %v966_v45 = vperm.slane %v958_v11, %v2600_v32 }
 0x1c2   :  { %v930_v9 = vperm.slane %v922_v3, %v2431_v49  ;;  %v550_v44 = vmul.f32 %v2993_v53, %v2947_v6  ;;  %v954_v8 = vperm.slane %v946_v34, %v2600_v32  ;;  %v678_v40 = vperm.slane %v672_v58, %v2431_v49 }
 0x1c3   :  { %v685_v38 = vrot.slane %v530_v35, 4  ;;  %v969_v55 = vrot.slane %v926_v20, 4  ;;  %v684_v63 = vsel %vm559_vm0, %v683_v15, %v530_v35  ;;  %v993_v10 = vrot.slane %v950_v60, 4  ;;  %v3057_v15 = vpop.permute.xlu2 %444 }
 0x1c4   :  { %v383_v42 = vpop.permute.xlu1 %382  ;;  %v962_v3 = vperm.slane %v956_v21, %v2600_v32  ;;  %v981_v11 = vrot.slane %v930_v9, 4  ;;  %v695_v34 = vrot.slane %v550_v44, 4  ;;  %v1005_v17 = vrot.slane %v966_v45, 4 }
 0x1c5   :  { %v547_v33 = vmul.f32 %v3024_v30, %v383_v42 }
 0x1c6   :  { %v1001_v2 = vrot.slane %v962_v3, 4 }
 0x1c7   :  { %v932_v27 = vsel %vm559_vm0, %v931_v31, %v547_v33  ;;  %v933_v56 = vrot.slane %v547_v33, 4  ;;  %v997_v33 = vrot.slane %v954_v8, 4 }
 0x1c8   :  { %v938_v39 = vperm.slane %v932_v27, %v2431_v49  ;;  %v690_v27 = vperm.slane %v684_v63, %v2431_v49 }
 0x1c9   :  { %v934_v24 = vsel %vm559_vm0, %v555_v22, %v933_v56 }
 0x1ca   :  { %v942_v6 = vperm.slane %v934_v24, %v2431_v49  ;;  %v967_v31 = vrot.slane %v938_v39, 4  ;;  %v970_v42 = vsel %vm559_vm0, %v938_v39, %v969_v55  ;;  %v682_v24 = vperm.slane %v674_v26, %v2431_v49 }
 0x1cb   :  { %v978_v58 = vperm.slane %v970_v42, %v2600_v32  ;;  %v686_v42 = vsel %vm559_vm0, %v538_v57, %v685_v38  ;;  %v1713_v57 = vld [vmem:[#allocation5 + $0x78] sm:$0xff] }
 0x1cc   :  { %v979_v37 = vrot.slane %v942_v6, 4  ;;  %v968_v35 = vsel %vm559_vm0, %v967_v31, %v926_v20  ;;  %v982_v22 = vsel %vm559_vm0, %v942_v6, %v981_v11  ;;  %v1745_v38 = vld [vmem:[#allocation5 + $0x178] sm:$0xff]  ;;  %1826 = vmatpush.msra.mxu0 %v1713_v57 }
 0x1cd   :  { %v3060_v21 = vsel %vm559_vm0, %v978_v58, %v997_v33  ;;  %v995_v56 = vrot.slane %v978_v58, 4  ;;  %v974_v55 = vperm.slane %v968_v35, %v2600_v32  ;;  %v990_v39 = vperm.slane %v982_v22, %v2600_v32  ;;  %1872 = vmatpush.msra.mxu2 %v1745_v38 }
 0x1ce   :  { %v980_v63 = vsel %vm559_vm0, %v979_v37, %v930_v9  ;;  %v719_v58 = vrot.slane %v690_v27, 4  ;;  %v698_v33 = vsel %vm559_vm0, %v550_v44, %v697_v41  ;;  %v721_v37 = vrot.slane %v678_v40, 4 }
 0x1cf   :  { %v3068_v20 = vsel %vm559_vm0, %v995_v56, %v954_v8  ;;  %v991_v11 = vrot.slane %v974_v55, 4  ;;  %v3071_v6 = vsel %vm559_vm0, %v974_v55, %v993_v10  ;;  %v3074_v31 = vsel %vm559_vm0, %v990_v39, %v1005_v17  ;;  %v1712_v56 = vld [vmem:[#allocation5 + $0x70] sm:$0xff] }
 0x1d0   :  { %v1003_v35 = vrot.slane %v990_v39, 4  ;;  %v986_v26 = vperm.slane %v980_v63, %v2600_v32  ;;  %v696_v9 = vsel %vm559_vm0, %v695_v34, %v3018_v19  ;;  %v554_v8 = vmul.f32 %v2989_v12, %v2957_v48  ;;  %v1744_v55 = vld [vmem:[#allocation5 + $0x170] sm:$0xff]  ;;  %1827 = vmatpush.msra.mxu0 %v1712_v56  ;;  %v1743_v56 = vld [vmem:[#allocation5 + $0x168] sm:$0xff] }
 0x1d1   :  { %v3083_v17 = vsel %vm559_vm0, %v991_v11, %v950_v60  ;;  %v694_v10 = vperm.slane %v686_v42, %v2431_v49  ;;  %v733_v19 = vrot.slane %v682_v24, 4  ;;  %1873 = vmatpush.msra.mxu2 %v1744_v55  ;;  %v702_v48 = vperm.slane %v696_v9, %v2431_v49 }
 0x1d2   :  { %3468 = vst [vmem:[#allocation12_spill] sm:$0xff] %v3083_v17  ;;  %v3087_v41 = vsel %vm559_vm0, %v1003_v35, %v966_v45  ;;  %v999_v44 = vrot.slane %v986_v26, 4  ;;  %v3090_v22 = vsel %vm559_vm0, %v986_v26, %v1001_v2  ;;  %v722_v60 = vsel %vm559_vm0, %v690_v27, %v721_v37  ;;  %v395_v26 = vpop.permute.xlu2 %394  ;;  %v1708_v17 = vld [vmem:[#allocation5 + $0x50] sm:$0xff] }
 0x1d3   :  { %v720_v39 = vsel %vm559_vm0, %v719_v58, %v678_v40  ;;  %v706_v45 = vperm.slane %v698_v33, %v2431_v49  ;;  %v707_v63 = vrot.slane %v554_v8, 4  ;;  %v731_v11 = vrot.slane %v694_v10, 4  ;;  %1874 = vmatpush.msra.mxu2 %v1743_v56 }
 0x1d4   :  { %v377_v34 = vpop.permute.xlu1 %376  ;;  %v3096_v42 = vsel %vm559_vm0, %v999_v44, %v962_v3  ;;  %v734_v35 = vsel %vm559_vm0, %v694_v10, %v733_v19  ;;  %v730_v9 = vperm.slane %v722_v60, %v2600_v32  ;;  %v3104_v27 = vperm.slane %v720_v39, %v2600_v32  ;;  %v1711_v44 = vld [vmem:[#allocation5 + $0x68] sm:$0xff] }
 0x1d5   :  { %3469 = vst [vmem:[#allocation13_spill] sm:$0xff] %v3096_v42  ;;  %v546_v2 = vmul.f32 %v3024_v30, %v377_v34  ;;  %v745_v40 = vrot.slane %v702_v48, 4  ;;  %v3107_v3 = vmul.f32 %v3024_v30, %v395_v26  ;;  %v757_v33 = vrot.slane %v706_v45, 4  ;;  %1828 = vmatpush.msra.mxu0 %v1711_v44  ;;  %v1742_v26 = vld [vmem:[#allocation5 + $0x160] sm:$0xff]  ;;  %v1761_v42 = vld [vmem:[#allocation5 + $0x1f8] sm:$0xff] }
 0x1d6   :  { %v3112_v10 = vperm.slane %v734_v35, %v2600_v32  ;;  %v732_v60 = vsel %vm559_vm0, %v731_v11, %v682_v24  ;;  %v557_v39 = vmul.f32 %v2989_v12, %v3057_v15  ;;  %v1710_v35 = vld [vmem:[#allocation5 + $0x60] sm:$0xff]  ;;  %1875 = vmatpush.msra.mxu2 %v1742_v26  ;;  %v1709_v24 = vld [vmem:[#allocation5 + $0x58] sm:$0xff]  ;;  %1895 = vmatpush.msra.mxu3 %v1761_v42  ;;  %v1727_v42 = vld [vmem:[#allocation5 + $0xe8] sm:$0xff] }
 0x1d7   :  { %v708_v57 = vsel %vm559_vm0, %v707_v63, %v546_v2  ;;  %v709_v38 = vrot.slane %v546_v2, 4  ;;  %v769_v2 = vrot.slane %v3104_v27, 4  ;;  %1829 = vmatpush.msra.mxu0 %v1710_v35  ;;  %v1729_v11 = vld [vmem:[#allocation5 + $0xf8] sm:$0xff]  ;;  %v1760_v35 = vld [vmem:[#allocation5 + $0x1f0] sm:$0xff] }
 0x1d8   :  { %v714_v58 = vperm.slane %v708_v57, %v2431_v49  ;;  %v1381_v57 = vrot.slane %v3107_v3, 4  ;;  %1849 = vmatpush.msra.mxu1 %v1729_v11  ;;  %1896 = vmatpush.msra.mxu3 %v1760_v35  ;;  %v1725_v35 = vld [vmem:[#allocation5 + $0xd8] sm:$0xff] }
 0x1d9   :  { %v710_v37 = vsel %vm559_vm0, %v554_v8, %v709_v38  ;;  %v773_v8 = vrot.slane %v730_v9, 4  ;;  %1830 = vmatpush.msra.mxu0 %v1709_v24  ;;  %v1739_v24 = vld [vmem:[#allocation5 + $0x148] sm:$0xff] }
 0x1da   :  { %v718_v55 = vperm.slane %v710_v37, %v2431_v49  ;;  %v743_v19 = vrot.slane %v714_v58, 4  ;;  %v746_v34 = vsel %vm559_vm0, %v714_v58, %v745_v40  ;;  %v1741_v58 = vld [vmem:[#allocation5 + $0x158] sm:$0xff]  ;;  %1850 = vmatpush.msra.mxu1 %v1728_v16  ;;  %v1707_v16 = vld [vmem:[#allocation5 + $0x48] sm:$0xff] }
 0x1db   :  { %v754_v63 = vperm.slane %v746_v34, %v2600_v32  ;;  %1876 = vmatpush.msra.mxu2 %v1741_v58  ;;  %1831 = vmatpush.msra.mxu0 %v1708_v17 }
 0x1dc   :  { %v755_v38 = vrot.slane %v718_v55, 4  ;;  %v744_v37 = vsel %vm559_vm0, %v743_v19, %v702_v48  ;;  %v758_v40 = vsel %vm559_vm0, %v718_v55, %v757_v33  ;;  %v738_v33 = vperm.slane %v732_v60, %v2600_v32  ;;  %v1740_v19 = vld [vmem:[#allocation5 + $0x150] sm:$0xff]  ;;  %1851 = vmatpush.msra.mxu1 %v1727_v42 }
 0x1dd   :  { %v774_v15 = vsel %vm559_vm0, %v754_v63, %v773_v8  ;;  %v771_v44 = vrot.slane %v754_v63, 4  ;;  %v750_v56 = vperm.slane %v744_v37, %v2600_v32  ;;  %v766_v34 = vperm.slane %v758_v40, %v2600_v32  ;;  %v3470_v40 = vld [vmem:[#allocation14_spill] sm:$0xff]  ;;  %1877 = vmatpush.msra.mxu2 %v1740_v19  ;;  %1832 = vmatpush.msra.mxu0 %v1707_v16  ;;  %v1705_v19 = vld [vmem:[#allocation5 + $0x38] sm:$0xff] }
 0x1de   :  { %v2130_v48 = vpack.i.bf16 %v774_v15, %v3060_v21  ;;  %v756_v55 = vsel %vm559_vm0, %v755_v38, %v706_v45  ;;  %v1379_v8 = vrot.slane %v557_v39, 4  ;;  %v3134_v11 = vmul.f32 %v2995_v5, %v3470_v40  ;;  %v1726_v15 = vld [vmem:[#allocation5 + $0xe0] sm:$0xff] }
 0x1df   :  { %v772_v63 = vsel %vm559_vm0, %v771_v44, %v730_v9  ;;  %v770_v26 = vsel %vm559_vm0, %v750_v56, %v769_v2  ;;  %v767_v37 = vrot.slane %v750_v56, 4  ;;  %v781_v60 = vrot.slane %v3112_v10, 4  ;;  %v1738_v44 = vld [vmem:[#allocation5 + $0x140] sm:$0xff]  ;;  %1878 = vmatpush.msra.mxu2 %v1739_v24  ;;  %1852 = vmatpush.msra.mxu1 %v1726_v15  ;;  %v1724_v24 = vld [vmem:[#allocation5 + $0xd0] sm:$0xff] }
 0x1e0   :  { %2131 = vrot.lane.b32.xlu1 %v2130_v48, %s2298_s21  ;;  %v2125_v21 = vpack.i.bf16 %v772_v63, %v3068_v20  ;;  %v2120_v45 = vpack.i.bf16 %v770_v26, %v3071_v6  ;;  %v1382_v9 = vsel %vm559_vm0, %v557_v39, %v1381_v57  ;;  %v779_v38 = vrot.slane %v766_v34, 4  ;;  %v1759_v20 = vld [vmem:[#allocation5 + $0x1e8] sm:$0xff]  ;;  %v1706_v57 = vld [vmem:[#allocation5 + $0x40] sm:$0xff]  ;;  %v1737_v26 = vld [vmem:[#allocation5 + $0x138] sm:$0xff] }
 0x1e1   :  { %v762_v2 = vperm.slane %v756_v55, %v2600_v32  ;;  %v3144_v58 = vsel %vm559_vm0, %v767_v37, %v3104_v27  ;;  %v1380_v6 = vsel %vm559_vm0, %v1379_v8, %v3107_v3  ;;  %v782_v17 = vsel %vm559_vm0, %v766_v34, %v781_v60  ;;  %1897 = vmatpush.msra.mxu3 %v1759_v20  ;;  %v1758_v55 = vld [vmem:[#allocation5 + $0x1e0] sm:$0xff]  ;;  %v289_v37 = vpop.permute.xlu0 %288  ;;  %v1704_v60 = vld [vmem:[#allocation5 + $0x30] sm:$0xff] }
 0x1e2   :  { %2126 = vrot.lane.b32.xlu0 %v2125_v21, %s2296_s0  ;;  %2121 = vrot.lane.b32.xlu2 %v2120_v45, %s2297_s1  ;;  %v777_v39 = vrot.slane %v738_v33, 4  ;;  %v3152_v56 = vperm.slane %v1382_v9, %v2431_v49  ;;  %v1369_v3 = vrot.slane %v3134_v11, 4  ;;  %v780_v8 = vsel %vm559_vm0, %v779_v38, %v3112_v10  ;;  %v1757_v45 = vld [vmem:[#allocation5 + $0x1d8] sm:$0xff]  ;;  %v1736_v20 = vld [vmem:[#allocation5 + $0x130] sm:$0xff]  ;;  %v1702_v15 = vld [vmem:[#allocation5 + $0x20] sm:$0xff] }
 0x1e3   :  { %v775_v48 = vrot.slane %v762_v2, 4  ;;  %1833 = vmatpush.msra.mxu0 %v1706_v57  ;;  %v3160_v40 = vperm.slane %v1380_v6, %v2431_v49  ;;  %v2145_v21 = vpack.i.bf16 %v782_v17, %v3074_v31  ;;  %1879 = vmatpush.msra.mxu2 %v1738_v44  ;;  %v540_v10 = vmul.f32 %v2963_v23, %v2977_v1  ;;  %v1756_v6 = vld [vmem:[#allocation5 + $0x1d0] sm:$0xff]  ;;  %v1703_v17 = vld [vmem:[#allocation5 + $0x28] sm:$0xff] }
 0x1e4   :  { %v420_v27 = vpop.permute.xlu1 %419  ;;  %v778_v63 = vsel %vm559_vm0, %v762_v2, %v777_v39  ;;  %1898 = vmatpush.msra.mxu3 %v1758_v55  ;;  %1853 = vmatpush.msra.mxu1 %v1725_v35  ;;  %v1427_v16 = vrot.slane %v3152_v56, 4  ;;  %v2140_v31 = vpack.i.bf16 %v780_v8, %v3087_v41  ;;  %v532_v23 = vmul.f32 %v2961_v18, %v289_v37  ;;  %v1723_v41 = vld [vmem:[#allocation5 + $0xc8] sm:$0xff]  ;;  %v1734_v55 = vld [vmem:[#allocation5 + $0x120] sm:$0xff] }
 0x1e5   :  { %v553_v34 = vmul.f32 %v2993_v53, %v420_v27  ;;  %v3164_v9 = vsel %vm559_vm0, %v775_v48, %v738_v33  ;;  %1834 = vmatpush.msra.mxu0 %v1705_v19  ;;  %v2135_v33 = vpack.i.bf16 %v778_v63, %v3090_v22  ;;  %1880 = vmatpush.msra.mxu2 %v1737_v26  ;;  %v1415_v39 = vrot.slane %v3160_v40, 4  ;;  %v1735_v22 = vld [vmem:[#allocation5 + $0x128] sm:$0xff]  ;;  %v1722_v48 = vld [vmem:[#allocation5 + $0xc0] sm:$0xff]  ;;  %v1701_v63 = vld [vmem:[#allocation5 + $0x18] sm:$0xff] }
 0x1e6   :  { %1899 = vmatpush.msra.mxu3 %v1757_v45  ;;  %1854 = vmatpush.msra.mxu1 %v1724_v24  ;;  %v1131_v27 = vrot.slane %v540_v10, 4  ;;  %v1133_v35 = vrot.slane %v532_v23, 4  ;;  %v1721_v26 = vld [vmem:[#allocation5 + $0xb8] sm:$0xff]  ;;  %v3198_v37 = vperm.slane %v3001_v52, %v2600_v32  ;;  %v1700_v24 = vld [vmem:[#allocation5 + $0x10] sm:$0xff] }
 0x1e7   :  { %v1367_v38 = vrot.slane %v553_v34, 4  ;;  %v1370_v2 = vsel %vm559_vm0, %v553_v34, %v1369_v3  ;;  %1835 = vmatpush.msra.mxu0 %v1704_v60  ;;  %1881 = vmatpush.msra.mxu2 %v1736_v20  ;;  %v1754_v3 = vld [vmem:[#allocation5 + $0x1c0] sm:$0xff]  ;;  %v1753_v52 = vld [vmem:[#allocation5 + $0x1b8] sm:$0xff]  ;;  %v1720_v20 = vld [vmem:[#allocation5 + $0xb0] sm:$0xff] }
 0x1e8   :  { %v3171_v42 = vperm.slane %v1370_v2, %v2431_v49  ;;  %2146 = vrot.lane.b32.xlu1 %v2145_v21, %s2298_s21  ;;  %1900 = vmatpush.msra.mxu3 %v1756_v6  ;;  %v3202_v21 = vperm.slane %v3008_v14, %v2600_v32  ;;  %v1132_v60 = vsel %vm559_vm0, %v1131_v27, %v532_v23 }
 0x1e9   :  { %v1368_v1 = vsel %vm559_vm0, %v1367_v38, %v3134_v11  ;;  %v1755_v11 = vld [vmem:[#allocation5 + $0x1c8] sm:$0xff]  ;;  %1836 = vmatpush.msra.mxu0 %v1703_v17  ;;  %1855 = vmatpush.msra.mxu1 %v1723_v41  ;;  %v364_v38 = vpop.permute.xlu2 %363  ;;  %v3471_v2 = vpack.i.bf16 %v2665_v62, %v2840_v25  ;;  %v1134_v14 = vsel %vm559_vm0, %v540_v10, %v1133_v35  ;;  %v1732_v10 = vld [vmem:[#allocation5 + $0x110] sm:$0xff] }
 0x1ea   :  { %v3181_v57 = vperm.slane %v1368_v1, %v2431_v49  ;;  %2141 = vrot.lane.b32.xlu0 %v2140_v31, %s2296_s0  ;;  %2136 = vrot.lane.b32.xlu2 %v2135_v33, %s2297_s1  ;;  %v1428_v18 = vsel %vm559_vm0, %v1427_v16, %v3171_v42  ;;  %v1733_v16 = vld [vmem:[#allocation5 + $0x118] sm:$0xff]  ;;  %v544_v33 = vmul.f32 %v2995_v5, %v364_v38  ;;  %v1752_v5 = vld [vmem:[#allocation5 + $0x1b0] sm:$0xff]  ;;  %v1699_v17 = vld [vmem:[#allocation5 + $0x8] sm:$0xff]  ;;  %v879_v38 = vrot.slane %v2928_v43, 4 }
 0x1eb   :  { %v3188_v44 = vperm.slane %v1428_v18, %v2600_v32  ;;  %1882 = vmatpush.msra.mxu2 %v1735_v22  ;;  %1901 = vmatpush.msra.mxu3 %v1755_v11  ;;  %v3472_v62 = vpack.i.bf16 %v2676_v13, %v2862_v51  ;;  %v3473_v25 = vpack.i.bf16 %v2866_v4, %v2870_v0  ;;  %v1731_v4 = vld [vmem:[#allocation5 + $0x108] sm:$0xff]  ;;  %v1718_v11 = vld [vmem:[#allocation5 + $0xa0] sm:$0xff] }
 0x1ec   :  { %v1416_v19 = vsel %vm559_vm0, %v1415_v39, %v3181_v57  ;;  %1837 = vmatpush.msra.mxu0 %v1702_v15  ;;  %1856 = vmatpush.msra.mxu1 %v1722_v48  ;;  %v1130_v1 = vperm.slane %v2895_v61, %v2431_v49  ;;  %v1138_v6 = vperm.slane %v1132_v60, %v2431_v49  ;;  %v1719_v39 = vld [vmem:[#allocation5 + $0xa8] sm:$0xff]  ;;  %v1145_v22 = vrot.slane %v544_v33, 4  ;;  %v1698_v61 = vld [vmem:[#allocation5] sm:$0xff] }
 0x1ed   :  { %v3193_v34 = vperm.slane %v1416_v19, %v2600_v32  ;;  %v1447_v8 = vrot.slane %v3188_v44, 4  ;;  %1883 = vmatpush.msra.mxu2 %v1734_v55  ;;  %1902 = vmatpush.msra.mxu3 %v1754_v3  ;;  %v1126_v13 = vperm.slane %v2898_v7, %v2431_v49  ;;  %v1142_v51 = vperm.slane %v1134_v14, %v2431_v49  ;;  %v1751_v0 = vld [vmem:[#allocation5 + $0x1a8] sm:$0xff]  ;;  %v1730_v15 = vld [vmem:[#allocation5 + $0x100] sm:$0xff]  ;;  %v389_v3 = vpop.permute.xlu0 %388  ;;  %v1748_v14 = vld [vmem:[#allocation5 + $0x190] sm:$0xff] }
 0x1ee   :  { %1838 = vmatpush.msra.mxu0 %v1701_v63  ;;  %1857 = vmatpush.msra.mxu1 %v1721_v26  ;;  %v1181_v27 = vrot.slane %v1130_v1, 4  ;;  %v655_v7 = vrot.slane %v2932_v29, 4  ;;  %v1167_v48 = vrot.slane %v1138_v6, 4  ;;  %v1750_v63 = vld [vmem:[#allocation5 + $0x1a0] sm:$0xff]  ;;  %v1717_v26 = vld [vmem:[#allocation5 + $0x98] sm:$0xff]  ;;  %v548_v29 = vmul.f32 %v3024_v30, %v389_v3 }
 0x1ef   :  { %v1439_v45 = vrot.slane %v3193_v34, 4  ;;  %v3212_v31 = vsel %vm559_vm0, %v1447_v8, %v3198_v37  ;;  %1884 = vmatpush.msra.mxu2 %v1733_v16  ;;  %1903 = vmatpush.msra.mxu3 %v1753_v52  ;;  %v1169_v19 = vrot.slane %v1126_v13, 4  ;;  %v1179_v35 = vrot.slane %v1142_v51, 4  ;;  %v1716_v16 = vld [vmem:[#allocation5 + $0x90] sm:$0xff] }
 0x1f0   :  { %2161 = vrot.lane.b32.xlu1 %v3471_v2, %s2298_s21  ;;  %1839 = vmatpush.msra.mxu0 %v1700_v24  ;;  %v1429_v8 = vrot.slane %v3171_v42, 4  ;;  %v1417_v42 = vrot.slane %v3181_v57, 4  ;;  %v1749_v2 = vld [vmem:[#allocation5 + $0x198] sm:$0xff]  ;;  %v1168_v43 = vsel %vm559_vm0, %v1167_v48, %v1126_v13  ;;  %v3259_v57 = vsel %vm559_vm0, %v655_v7, %v2925_v50  ;;  %v1715_v24 = vld [vmem:[#allocation5 + $0x88] sm:$0xff] }
 0x1f1   :  { %v3218_v23 = vsel %vm559_vm0, %v1439_v45, %v3202_v21  ;;  %1858 = vmatpush.msra.mxu1 %v1720_v20  ;;  %1885 = vmatpush.msra.mxu2 %v1732_v10  ;;  %v1182_v45 = vsel %vm559_vm0, %v1142_v51, %v1181_v27  ;;  %v1170_v30 = vsel %vm559_vm0, %v1138_v6, %v1169_v19  ;;  %v1157_v20 = vrot.slane %v548_v29, 4 }
 0x1f2   :  { %2156 = vrot.lane.b32.xlu0 %v3472_v62, %s2296_s0  ;;  %2151 = vrot.lane.b32.xlu2 %v3473_v25, %s2297_s1  ;;  %v1178_v50 = vperm.slane %v1170_v30, %v2600_v32  ;;  %v3477_v25 = vld [vmem:[#allocation11_spill] sm:$0xff]  ;;  %v1418_v6 = vsel %vm559_vm0, %v3160_v40, %v1417_v42 }
 0x1f3   :  { %1904 = vmatpush.msra.mxu3 %v1752_v5  ;;  %1840 = vmatpush.msra.mxu0 %v1699_v17  ;;  %v1414_v10 = vperm.slane %v3477_v25, %v2600_v32  ;;  %v1426_v48 = vperm.slane %v1418_v6, %v2600_v32 }
 0x1f4   :  { %v414_v41 = vpop.permute.xlu1 %413  ;;  %1859 = vmatpush.msra.mxu1 %v1719_v39  ;;  %1886 = vmatpush.msra.mxu2 %v1731_v4  ;;  %v1714_v39 = vld [vmem:[#allocation5 + $0x80] sm:$0xff]  ;;  %v1221_v7 = vrot.slane %v1178_v50, 4 }
 0x1f5   :  { %v552_v18 = vmul.f32 %v2993_v53, %v414_v41  ;;  %1905 = vmatpush.msra.mxu3 %v1751_v0  ;;  %v3474_v53 = vpack.i.bf16 %v2655_v28, %v2828_v46  ;;  %1841 = vmatpush.msra.mxu0 %v1698_v61  ;;  %v3475_v28 = vpack.i.bf16 %v2672_v36, %v2846_v47  ;;  %v3479_v41 = vld [vmem:[#allocation28_spill] sm:$0xff]  ;;  %v1443_v30 = vrot.slane %v1426_v48, 4 }
 0x1f6   :  { %1860 = vmatpush.msra.mxu1 %v1718_v11  ;;  %1887 = vmatpush.msra.mxu2 %v1730_v15  ;;  %v3476_v46 = vpack.i.bf16 %v2855_v59, %v2859_v54  ;;  %v3265_v59 = vperm.slane %v1182_v45, %v2600_v32  ;;  %v1430_v54 = vsel %vm559_vm0, %v3152_v56, %v1429_v8  ;;  %v1746_v11 = vld [vmem:[#allocation5 + $0x180] sm:$0xff]  ;;  %v3294_v15 = vpop.permute.xlu2 %2096 }
 0x1f7   :  { %v1143_v55 = vrot.slane %v552_v18, 4  ;;  %v1146_v60 = vsel %vm559_vm0, %v552_v18, %v1145_v22  ;;  %1906 = vmatpush.msra.mxu3 %v1750_v63  ;;  %v3278_v56 = vperm.slane %v1168_v43, %v2600_v32  ;;  %v1402_v4 = vperm.slane %v3479_v41, %v2600_v32 }
 0x1f8   :  { %2176 = vrot.lane.b32.xlu1 %v3474_v53, %s2298_s21  ;;  %1861 = vmatpush.msra.mxu1 %v1717_v26  ;;  %v3262_v36 = vperm.slane %v1146_v60, %v2431_v49  ;;  %v1438_v0 = vperm.slane %v1430_v54, %v2600_v32  ;;  %v1229_v18 = vrot.slane %v3265_v59, 4  ;;  %v1441_v63 = vrot.slane %v3202_v21, 4 }
 0x1f9   :  { %v1144_v52 = vsel %vm559_vm0, %v1143_v55, %v544_v33  ;;  %v1180_v33 = vsel %vm559_vm0, %v1179_v35, %v1130_v1  ;;  %1907 = vmatpush.msra.mxu3 %v1749_v2  ;;  %v3478_v1 = vld [vmem:[#allocation27_spill] sm:$0xff]  ;;  %v1453_v55 = vrot.slane %v1414_v10, 4  ;;  %v1217_v3 = vrot.slane %v3278_v56, 4 }
 0x1fa   :  { %2171 = vrot.lane.b32.xlu0 %v3475_v28, %s2296_s0  ;;  %2166 = vrot.lane.b32.xlu2 %v3476_v46, %s2297_s1  ;;  %v1150_v5 = vperm.slane %v1144_v52, %v2431_v49  ;;  %v3282_v17 = vsel %vm559_vm0, %v879_v38, %v3478_v1  ;;  %v1205_v40 = vrot.slane %v3262_v36, 4  ;;  %v3292_v61 = vperm.slane %v1180_v33, %v2600_v32 }
 0x1fb   :  { %1862 = vmatpush.msra.mxu1 %v1716_v16  ;;  %1908 = vmatpush.msra.mxu3 %v1748_v14  ;;  %v1445_v53 = vrot.slane %v1402_v4, 4  ;;  %v1454_v45 = vsel %vm559_vm0, %v1438_v0, %v1453_v55  ;;  %v1451_v28 = vrot.slane %v1438_v0, 4  ;;  %v1444_v6 = vsel %vm559_vm0, %v1443_v30, %v1402_v4  ;;  %v3481_v0 = vld [vmem:[#allocation18_spill] sm:$0xff] }
 0x1fc   :  { %v439_v47 = vpop.permute.xlu1 %438  ;;  %v1193_v19 = vrot.slane %v1150_v5, 4 }
 0x1fd   :  { %v556_v62 = vmul.f32 %v2989_v12, %v439_v47  ;;  %v1747_v12 = vld [vmem:[#allocation5 + $0x188] sm:$0xff]  ;;  %1863 = vmatpush.msra.mxu1 %v1715_v24  ;;  %v1446_v46 = vsel %vm559_vm0, %v1426_v48, %v1445_v53  ;;  %v1449_v48 = vrot.slane %v3198_v37, 4 }
 0x1fe   :  { %1909 = vmatpush.msra.mxu3 %v1747_v12  ;;  %v1452_v12 = vsel %vm559_vm0, %v1451_v28, %v1414_v10  ;;  %v2107_v41 = vpop.permute.xlu2 %2106  ;;  %v887_v10 = vrot.slane %v3481_v0, 4  ;;  %v1802_v0 = vld [vmem:[#allocation5 + $0x340] sm:$0xff] }
 0x1ff   :  { %v1155_v13 = vrot.slane %v556_v62, 4  ;;  %v1158_v51 = vsel %vm559_vm0, %v556_v62, %v1157_v20  ;;  %1864 = vmatpush.msra.mxu1 %v1714_v39  ;;  %v1442_v20 = vsel %vm559_vm0, %v3193_v34, %v1441_v63  ;;  %v2108_v55 = vunpack.i.l.bf16 %v2107_v41  ;;  %v3482_v63 = vld [vmem:[#allocation15_spill] sm:$0xff] }
 0x200   :  { %v1166_v22 = vperm.slane %v1158_v51, %v2431_v49  ;;  %1910 = vmatpush.msra.mxu3 %v1746_v11  ;;  %v3480_v51 = vld [vmem:[#allocation17_spill] sm:$0xff] }
 0x201   :  { %v1156_v27 = vsel %vm559_vm0, %v1155_v13, %v548_v29 }
 0x202   :  { %v1162_v35 = vperm.slane %v1156_v27, %v2431_v49  ;;  %v1206_v8 = vsel %vm559_vm0, %v1166_v22, %v1205_v40  ;;  %v1203_v60 = vrot.slane %v1166_v22, 4  ;;  %v2099_v40 = vunpack.i.h.bf16 %v3294_v15 }
 0x203   :  { %v1214_v26 = vperm.slane %v1206_v8, %v2600_v32  ;;  %v2098_v22 = vunpack.i.l.bf16 %v3294_v15  ;;  %v2109_v27 = vunpack.i.h.bf16 %v2107_v41  ;;  %v1450_v8 = vsel %vm559_vm0, %v3188_v44, %v1449_v48  ;;  %v1823_v41 = vld [vmem:[#allocation5 + $0x3e8] sm:$0xff] }
 0x204   :  { %v1191_v29 = vrot.slane %v1162_v35, 4  ;;  %v2092_v38 = vpop.permute.xlu1 %2091  ;;  %v1194_v42 = vsel %vm559_vm0, %v1162_v35, %v1193_v19  ;;  %v1204_v25 = vsel %vm559_vm0, %v1203_v60, %v3262_v36  ;;  %v1787_v48 = vld [vmem:[#allocation5 + $0x2c8] sm:$0xff] }
 0x205   :  { %v1202_v49 = vperm.slane %v1194_v42, %v2600_v32  ;;  %v1230_v2 = vsel %vm559_vm0, %v1214_v26, %v1229_v18  ;;  %v2094_v16 = vunpack.i.h.bf16 %v2092_v38  ;;  %v1227_v43 = vrot.slane %v1214_v26, 4  ;;  %v3483_v26 = vld [vmem:[#allocation16_spill] sm:$0xff] }
 0x206   :  { %v1192_v21 = vsel %vm559_vm0, %v1191_v29, %v1150_v5  ;;  %v2205_v52 = vpack.i.bf16 %v1230_v2, %v1454_v45  ;;  %v2093_v47 = vunpack.i.l.bf16 %v2092_v38  ;;  %v3331_v4 = vperm.slane %v1204_v25, %v2600_v32  ;;  %v1773_v25 = vld [vmem:[#allocation5 + $0x258] sm:$0xff] }
 0x207   :  { %v1222_v54 = vsel %vm559_vm0, %v1202_v49, %v1221_v7  ;;  %v1219_v14 = vrot.slane %v1202_v49, 4  ;;  %v3311_v33 = vperm.slane %v1192_v21, %v2600_v32  ;;  %v1228_v62 = vsel %vm559_vm0, %v1227_v43, %v3265_v59  ;;  %v1777_v21 = vld [vmem:[#allocation5 + $0x278] sm:$0xff]  ;;  %v1776_v43 = vld [vmem:[#allocation5 + $0x270] sm:$0xff] }
 0x208   :  { %v2190_v24 = vpack.i.bf16 %v1222_v54, %v1446_v46  ;;  %v2200_v34 = vpack.i.bf16 %v1228_v62, %v1452_v12  ;;  %v663_v59 = vrot.slane %v3480_v51, 4  ;;  %v1648_v36 = vsel %vm1647_vm1, %v3259_v57, %v2094_v16  ;;  %1918 = vmatpush.msrb.mxu0 %v1777_v21  ;;  %v1775_v54 = vld [vmem:[#allocation5 + $0x268] sm:$0xff]  ;;  %v1793_v62 = vld [vmem:[#allocation5 + $0x2f8] sm:$0xff]  ;;  %v1792_v12 = vld [vmem:[#allocation5 + $0x2f0] sm:$0xff] }
 0x209   :  { %v1220_v5 = vsel %vm559_vm0, %v1219_v14, %v1178_v50  ;;  %v1218_v1 = vsel %vm559_vm0, %v3311_v33, %v1217_v3  ;;  %v1662_v50 = vsel %vm1647_vm1, %v3282_v17, %v2093_v47  ;;  %v1225_v17 = vrot.slane %v3292_v61, 4  ;;  %v2112_v3 = vpop.permute.xlu0 %2111  ;;  %v1808_v47 = vld [vmem:[#allocation5 + $0x370] sm:$0xff]  ;;  %v1807_v14 = vld [vmem:[#allocation5 + $0x368] sm:$0xff]  ;;  %1941 = vmatpush.msrb.mxu1 %v1793_v62  ;;  %v1810_v62 = vld [vmem:[#allocation5 + $0x380] sm:$0xff] }
 0x20a   :  { %2191 = vrot.lane.b32.xlu1 %v2190_v24, %s2298_s21  ;;  %v2185_v39 = vpack.i.bf16 %v1220_v5, %v1444_v6  ;;  %v2180_v13 = vpack.i.bf16 %v1218_v1, %v1442_v20  ;;  %v1651_v32 = vsel %vm1650_vm3, %v1648_v36, %v2099_v40  ;;  %v1664_v7 = vsel %vm1650_vm3, %v1662_v50, %v2098_v22  ;;  %v1774_v24 = vld [vmem:[#allocation5 + $0x260] sm:$0xff]  ;;  %v1805_v5 = vld [vmem:[#allocation5 + $0x358] sm:$0xff]  ;;  %v1772_v1 = vld [vmem:[#allocation5 + $0x250] sm:$0xff] }
 0x20b   :  { %v1226_v35 = vsel %vm559_vm0, %v3331_v4, %v1225_v17  ;;  %v664_v37 = vsel %vm559_vm0, %v663_v59, %v3482_v63  ;;  %v888_v45 = vsel %vm559_vm0, %v887_v10, %v3483_v26  ;;  %v2114_v38 = vunpack.i.h.bf16 %v2112_v3  ;;  %1919 = vmatpush.msrb.mxu0 %v1776_v43  ;;  %v1806_v20 = vld [vmem:[#allocation5 + $0x360] sm:$0xff]  ;;  %v1825_v6 = vld [vmem:[#allocation5 + $0x3f8] sm:$0xff]  ;;  %1942 = vmatpush.msrb.mxu1 %v1792_v12  ;;  %v1791_v51 = vld [vmem:[#allocation5 + $0x2e8] sm:$0xff] }
 0x20c   :  { %v2102_v18 = vpop.permute.xlu1 %2101  ;;  %2186 = vrot.lane.b32.xlu0 %v2185_v39, %s2296_s0  ;;  %2181 = vrot.lane.b32.xlu2 %v2180_v13, %s2297_s1  ;;  %v2195_v53 = vpack.i.bf16 %v1226_v35, %v1450_v8  ;;  %v1656_v29 = vsel %vm1647_vm1, %v664_v37, %v2109_v27  ;;  %v1668_v60 = vsel %vm1647_vm1, %v888_v45, %v2108_v55  ;;  %v2113_v42 = vunpack.i.l.bf16 %v2112_v3  ;;  %v1804_v39 = vld [vmem:[#allocation5 + $0x350] sm:$0xff]  ;;  %v1803_v59 = vld [vmem:[#allocation5 + $0x348] sm:$0xff]  ;;  %v1770_v36 = vld [vmem:[#allocation5 + $0x240] sm:$0xff] }
 0x20d   :  { %v2104_v11 = vunpack.i.h.bf16 %v2102_v18  ;;  %v2103_v57 = vunpack.i.l.bf16 %v2102_v18  ;;  %v1658_v46 = vsel %vm1650_vm3, %v1656_v29, %v2114_v38  ;;  %1920 = vmatpush.msrb.mxu0 %v1775_v54  ;;  %1987 = vmatpush.msrb.mxu3 %v1825_v6  ;;  %v1824_v13 = vld [vmem:[#allocation5 + $0x3f0] sm:$0xff]  ;;  %v1790_v50 = vld [vmem:[#allocation5 + $0x2e0] sm:$0xff]  ;;  %v1769_v40 = vld [vmem:[#allocation5 + $0x238] sm:$0xff] }
 0x20e   :  { %v1670_v30 = vsel %vm1650_vm3, %v1668_v60, %v2113_v42  ;;  %1943 = vmatpush.msrb.mxu1 %v1791_v51  ;;  %v1822_v10 = vld [vmem:[#allocation5 + $0x3e0] sm:$0xff]  ;;  %v1789_v22 = vld [vmem:[#allocation5 + $0x2d8] sm:$0xff]  ;;  %v1788_v17 = vld [vmem:[#allocation5 + $0x2d0] sm:$0xff] }
 0x20f   :  { %v1654_v15 = vsel %vm1653_vm2, %v1651_v32, %v2104_v11  ;;  %v1666_v19 = vsel %vm1653_vm2, %v1664_v7, %v2103_v57  ;;  %1921 = vmatpush.msrb.mxu0 %v1774_v24  ;;  %1988 = vmatpush.msrb.mxu3 %v1824_v13  ;;  %v1801_v18 = vld [vmem:[#allocation5 + $0x338] sm:$0xff]  ;;  %v1768_v57 = vld [vmem:[#allocation5 + $0x230] sm:$0xff]  ;;  %v1767_v7 = vld [vmem:[#allocation5 + $0x228] sm:$0xff] }
 0x210   :  { %1842 = vmatmul.f32.vlgmr.msra.gmra.mxu0 %v1654_v15  ;;  %1888 = vmatmul.f32.vlgmr.msra.gmra.mxu2 %v1666_v19  ;;  %v1821_v11 = vld [vmem:[#allocation5 + $0x3d8] sm:$0xff]  ;;  %v1800_v27 = vld [vmem:[#allocation5 + $0x330] sm:$0xff]  ;;  %v1799_v55 = vld [vmem:[#allocation5 + $0x328] sm:$0xff] }
 0x211   :  { %1922 = vmatpush.msrb.mxu0 %v1773_v25  ;;  %1989 = vmatpush.msrb.mxu3 %v1823_v41  ;;  %v1820_v32 = vld [vmem:[#allocation5 + $0x3d0] sm:$0xff]  ;;  %v1819_v15 = vld [vmem:[#allocation5 + $0x3c8] sm:$0xff]  ;;  %v1766_v19 = vld [vmem:[#allocation5 + $0x220] sm:$0xff] }
 0x212   :  { %2206 = vrot.lane.b32.xlu1 %v2205_v52, %s2298_s21  ;;  %v1809_v52 = vld [vmem:[#allocation5 + $0x378] sm:$0xff]  ;;  %1944 = vmatpush.msrb.mxu1 %v1790_v50  ;;  %v1786_v35 = vld [vmem:[#allocation5 + $0x2c0] sm:$0xff]  ;;  %v1764_v45 = vld [vmem:[#allocation5 + $0x210] sm:$0xff] }
 0x213   :  { %1964 = vmatpush.msrb.mxu2 %v1809_v52  ;;  %1923 = vmatpush.msrb.mxu0 %v1772_v1  ;;  %v1798_v3 = vld [vmem:[#allocation5 + $0x320] sm:$0xff]  ;;  %v1785_v63 = vld [vmem:[#allocation5 + $0x2b8] sm:$0xff]  ;;  %v1784_v29 = vld [vmem:[#allocation5 + $0x2b0] sm:$0xff] }
 0x214   :  { %v2117_v28 = vpop.permute.xlu1 %2116  ;;  %2201 = vrot.lane.b32.xlu0 %v2200_v34, %s2296_s0  ;;  %2196 = vrot.lane.b32.xlu2 %v2195_v53, %s2297_s1  ;;  %v1771_v34 = vld [vmem:[#allocation5 + $0x248] sm:$0xff]  ;;  %v1818_v8 = vld [vmem:[#allocation5 + $0x3c0] sm:$0xff]  ;;  %v1765_v53 = vld [vmem:[#allocation5 + $0x218] sm:$0xff] }
 0x215   :  { %v2119_v44 = vunpack.i.h.bf16 %v2117_v28  ;;  %v2118_v49 = vunpack.i.l.bf16 %v2117_v28  ;;  %1965 = vmatpush.msrb.mxu2 %v1808_v47  ;;  %1924 = vmatpush.msrb.mxu0 %v1771_v34  ;;  %v1797_v37 = vld [vmem:[#allocation5 + $0x318] sm:$0xff]  ;;  %v1796_v60 = vld [vmem:[#allocation5 + $0x310] sm:$0xff]  ;;  %v1763_v42 = vld [vmem:[#allocation5 + $0x208] sm:$0xff] }
 0x216   :  { %1990 = vmatpush.msrb.mxu3 %v1822_v10  ;;  %1945 = vmatpush.msrb.mxu1 %v1789_v22  ;;  %v1817_v26 = vld [vmem:[#allocation5 + $0x3b8] sm:$0xff]  ;;  %v1816_v38 = vld [vmem:[#allocation5 + $0x3b0] sm:$0xff]  ;;  %v1783_v28 = vld [vmem:[#allocation5 + $0x2a8] sm:$0xff] }
 0x217   :  { %v1660_v2 = vsel %vm1653_vm2, %v1658_v46, %v2119_v44  ;;  %v1672_v16 = vsel %vm1653_vm2, %v1670_v30, %v2118_v49  ;;  %1966 = vmatpush.msrb.mxu2 %v1807_v14  ;;  %1925 = vmatpush.msrb.mxu0 %v1770_v36  ;;  %v1795_v44 = vld [vmem:[#allocation5 + $0x308] sm:$0xff]  ;;  %v1762_v46 = vld [vmem:[#allocation5 + $0x200] sm:$0xff]  ;;  %v1781_v52 = vld [vmem:[#allocation5 + $0x298] sm:$0xff] }
 0x218   :  { %1865 = vmatmul.f32.vlgmr.msra.gmra.mxu1 %v1660_v2  ;;  %1911 = vmatmul.f32.vlgmr.msra.gmra.mxu3 %v1672_v16  ;;  %v1815_v49 = vld [vmem:[#allocation5 + $0x3a8] sm:$0xff]  ;;  %v1782_v30 = vld [vmem:[#allocation5 + $0x2a0] sm:$0xff]  ;;  %v1813_v43 = vld [vmem:[#allocation5 + $0x398] sm:$0xff] }
 0x219   :  { %1967 = vmatpush.msrb.mxu2 %v1806_v20  ;;  %1926 = vmatpush.msrb.mxu0 %v1769_v40  ;;  %v1794_v2 = vld [vmem:[#allocation5 + $0x300] sm:$0xff]  ;;  %v1780_v47 = vld [vmem:[#allocation5 + $0x290] sm:$0xff]  ;;  %v1779_v14 = vld [vmem:[#allocation5 + $0x288] sm:$0xff] }
 0x21a   :  { %1991 = vmatpush.msrb.mxu3 %v1821_v11  ;;  %1946 = vmatpush.msrb.mxu1 %v1788_v17  ;;  %v1814_v16 = vld [vmem:[#allocation5 + $0x3a0] sm:$0xff]  ;;  %v1812_v54 = vld [vmem:[#allocation5 + $0x390] sm:$0xff]  ;;  %v1811_v24 = vld [vmem:[#allocation5 + $0x388] sm:$0xff] }
 0x21b   :  { %1968 = vmatpush.msrb.mxu2 %v1805_v5  ;;  %1927 = vmatpush.msrb.mxu0 %v1768_v57  ;;  %v1778_v20 = vld [vmem:[#allocation5 + $0x280] sm:$0xff]  ;;  %v3484_v41 = vld [vmem:[#allocation12_spill] sm:$0xff] }
 0x21c   :  { %1992 = vmatpush.msrb.mxu3 %v1820_v32  ;;  %1947 = vmatpush.msrb.mxu1 %v1787_v48 }
 0x21d   :  { %1969 = vmatpush.msrb.mxu2 %v1804_v39  ;;  %1928 = vmatpush.msrb.mxu0 %v1767_v7 }
 0x21e   :  { %1993 = vmatpush.msrb.mxu3 %v1819_v15  ;;  %1948 = vmatpush.msrb.mxu1 %v1786_v35 }
 0x21f   :  { %1970 = vmatpush.msrb.mxu2 %v1803_v59  ;;  %1929 = vmatpush.msrb.mxu0 %v1766_v19 }
 0x220   :  { %1994 = vmatpush.msrb.mxu3 %v1818_v8  ;;  %1949 = vmatpush.msrb.mxu1 %v1785_v63 }
 0x221   :  { %1971 = vmatpush.msrb.mxu2 %v1802_v0  ;;  %1930 = vmatpush.msrb.mxu0 %v1765_v53  ;;  %v3486_v53 = vld [vmem:[#allocation26_spill] sm:$0xff] }
 0x222   :  { %1995 = vmatpush.msrb.mxu3 %v1817_v26  ;;  %1950 = vmatpush.msrb.mxu1 %v1784_v29  ;;  %v1327_v63 = vrot.slane %v3486_v53, 4 }
 0x223   :  { %1972 = vmatpush.msrb.mxu2 %v1801_v18  ;;  %1931 = vmatpush.msrb.mxu0 %v1764_v45 }
 0x224   :  { %1996 = vmatpush.msrb.mxu3 %v1816_v38  ;;  %1951 = vmatpush.msrb.mxu1 %v1783_v28  ;;  %v3488_v28 = vld [vmem:[#allocation22_spill] sm:$0xff] }
 0x225   :  { %1973 = vmatpush.msrb.mxu2 %v1800_v27  ;;  %1932 = vmatpush.msrb.mxu0 %v1763_v42 }
 0x226   :  { %1997 = vmatpush.msrb.mxu3 %v1815_v49  ;;  %1952 = vmatpush.msrb.mxu1 %v1782_v30  ;;  %v3489_v49 = vld [vmem:[#allocation19_spill] sm:$0xff] }
 0x227   :  { %1974 = vmatpush.msrb.mxu2 %v1799_v55  ;;  %1933 = vmatpush.msrb.mxu0 %v1762_v46  ;;  %v3485_v55 = vld [vmem:[#allocation13_spill] sm:$0xff]  ;;  %v1328_v46 = vsel %vm559_vm0, %v1327_v63, %v3489_v49 }
 0x228   :  { %1998 = vmatpush.msrb.mxu3 %v1814_v16  ;;  %1953 = vmatpush.msrb.mxu1 %v1781_v52 }
 0x229   :  { %1975 = vmatpush.msrb.mxu2 %v1798_v3 }
 0x22a   :  { %1999 = vmatpush.msrb.mxu3 %v1813_v43  ;;  %1954 = vmatpush.msrb.mxu1 %v1780_v47 }
 0x22b   :  { %1976 = vmatpush.msrb.mxu2 %v1797_v37  ;;  %v3487_v37 = vld [vmem:[#allocation24_spill] sm:$0xff] }
 0x22c   :  { %2000 = vmatpush.msrb.mxu3 %v1812_v54  ;;  %1955 = vmatpush.msrb.mxu1 %v1779_v14  ;;  %v1103_v26 = vrot.slane %v3487_v37, 4 }
 0x22d   :  { %1977 = vmatpush.msrb.mxu2 %v1796_v60 }
 0x22e   :  { %2001 = vmatpush.msrb.mxu3 %v1811_v24  ;;  %1956 = vmatpush.msrb.mxu1 %v1778_v20  ;;  %v3490_v24 = vld [vmem:[#allocation25_spill] sm:$0xff] }
 0x22f   :  { %1978 = vmatpush.msrb.mxu2 %v1795_v44  ;;  %v1104_v44 = vsel %vm559_vm0, %v1103_v26, %v3488_v28  ;;  %v1335_v20 = vrot.slane %v3490_v24, 4 }
 0x230   :  { %2002 = vmatpush.msrb.mxu3 %v1810_v62  ;;  %v3491_v62 = vld [vmem:[#allocation23_spill] sm:$0xff] }
 0x231   :  { %1979 = vmatpush.msrb.mxu2 %v1794_v2 }
 0x23c   :  { %v2122_v21 = vpop.permute.xlu2 %2121 }
 0x23d   :  { %v2124_v25 = vunpack.i.h.bf16 %v2122_v21  ;;  %v2123_v5 = vunpack.i.l.bf16 %v2122_v21 }
 0x23f   :  { %v1649_v59 = vsel %vm1647_vm1, %v3144_v58, %v2124_v25  ;;  %v1663_v36 = vsel %vm1647_vm1, %v3484_v41, %v2123_v5  ;;  %v1111_v25 = vrot.slane %v3491_v62, 4 }
 0x244   :  { %v2137_v1 = vpop.permute.xlu2 %2136 }
 0x245   :  { %v2139_v22 = vunpack.i.h.bf16 %v2137_v1  ;;  %v2138_v18 = vunpack.i.l.bf16 %v2137_v1 }
 0x247   :  { %v1657_v48 = vsel %vm1647_vm1, %v3164_v9, %v2139_v22  ;;  %v1669_v15 = vsel %vm1647_vm1, %v3485_v55, %v2138_v18 }
 0x24c   :  { %v2152_v17 = vpop.permute.xlu2 %2151 }
 0x24d   :  { %v2154_v45 = vunpack.i.h.bf16 %v2152_v17  ;;  %v2153_v29 = vunpack.i.l.bf16 %v2152_v17  ;;  %v1215_v17 = vrot.slane %v3311_v33, 4 }
 0x24f   :  { %v1674_v16 = vsel %vm1647_vm1, %v1104_v44, %v2154_v45  ;;  %v1686_v21 = vsel %vm1647_vm1, %v1328_v46, %v2153_v29  ;;  %v1223_v45 = vrot.slane %v3331_v4, 4 }
 0x252   :  { %v2132_v6 = vpop.permute.xlu1 %2131 }
 0x253   :  { %v2134_v34 = vunpack.i.h.bf16 %v2132_v6  ;;  %v2133_v51 = vunpack.i.l.bf16 %v2132_v6 }
 0x254   :  { %v2127_v12 = vpop.permute.xlu0 %2126  ;;  %v2167_v52 = vpop.permute.xlu2 %2166 }
 0x255   :  { %v2129_v39 = vunpack.i.h.bf16 %v2127_v12  ;;  %v2128_v13 = vunpack.i.l.bf16 %v2127_v12  ;;  %v2169_v5 = vunpack.i.h.bf16 %v2167_v52  ;;  %v2168_v6 = vunpack.i.l.bf16 %v2167_v52 }
 0x257   :  { %v1652_v50 = vsel %vm1650_vm3, %v1649_v59, %v2129_v39  ;;  %v1665_v0 = vsel %vm1650_vm3, %v1663_v36, %v2128_v13  ;;  %v3493_v59 = vld [vmem:[#allocation20_spill] sm:$0xff] }
 0x258   :  { %v1655_v10 = vsel %vm1653_vm2, %v1652_v50, %v2134_v34  ;;  %v1667_v40 = vsel %vm1653_vm2, %v1665_v0, %v2133_v51  ;;  %v3492_v34 = vld [vmem:[#allocation21_spill] sm:$0xff]  ;;  %v1336_v41 = vsel %vm559_vm0, %v1335_v20, %v3493_v59 }
 0x259   :  { %1845 = vmatmul.f32.gmra.mxu0 %v1655_v10  ;;  %1891 = vmatmul.f32.gmra.mxu2 %v1667_v40  ;;  %v1112_v51 = vsel %vm559_vm0, %v1111_v25, %v3492_v34  ;;  %v1692_v10 = vsel %vm1647_vm1, %v1336_v41, %v2168_v6 }
 0x25a   :  { %v2147_v11 = vpop.permute.xlu1 %2146  ;;  %v1680_v0 = vsel %vm1647_vm1, %v1112_v51, %v2169_v5 }
 0x25b   :  { %v2149_v32 = vunpack.i.h.bf16 %v2147_v11  ;;  %v2148_v7 = vunpack.i.l.bf16 %v2147_v11 }
 0x25c   :  { %v2142_v57 = vpop.permute.xlu0 %2141 }
 0x25d   :  { %v2144_v27 = vunpack.i.h.bf16 %v2142_v57  ;;  %v2143_v58 = vunpack.i.l.bf16 %v2142_v57 }
 0x25f   :  { %v1659_v19 = vsel %vm1650_vm3, %v1657_v48, %v2144_v27  ;;  %v1671_v35 = vsel %vm1650_vm3, %v1669_v15, %v2143_v58  ;;  %v1216_v15 = vsel %vm559_vm0, %v1215_v17, %v3278_v56 }
 0x260   :  { %v1661_v3 = vsel %vm1653_vm2, %v1659_v19, %v2149_v32  ;;  %v1673_v8 = vsel %vm1653_vm2, %v1671_v35, %v2148_v7 }
 0x261   :  { %1868 = vmatmul.f32.gmra.mxu1 %v1661_v3  ;;  %1914 = vmatmul.f32.gmra.mxu3 %v1673_v8 }
 0x262   :  { %v2162_v9 = vpop.permute.xlu1 %2161 }
 0x263   :  { %v2164_v30 = vunpack.i.h.bf16 %v2162_v9  ;;  %v2163_v2 = vunpack.i.l.bf16 %v2162_v9 }
 0x264   :  { %v2157_v60 = vpop.permute.xlu0 %2156 }
 0x265   :  { %v2159_v38 = vunpack.i.h.bf16 %v2157_v60  ;;  %v2158_v42 = vunpack.i.l.bf16 %v2157_v60 }
 0x266   :  { %v2182_v57 = vpop.permute.xlu2 %2181 }
 0x267   :  { %v1676_v43 = vsel %vm1650_vm3, %v1674_v16, %v2159_v38  ;;  %v1688_v47 = vsel %vm1650_vm3, %v1686_v21, %v2158_v42  ;;  %v2184_v27 = vunpack.i.h.bf16 %v2182_v57  ;;  %v2183_v58 = vunpack.i.l.bf16 %v2182_v57 }
 0x268   :  { %v1678_v54 = vsel %vm1653_vm2, %v1676_v43, %v2164_v30  ;;  %v1690_v14 = vsel %vm1653_vm2, %v1688_v47, %v2163_v2 }
 0x269   :  { %1934 = vmatmul.f32.vlgmr.msrb.gmra.mxu0 %v1678_v54  ;;  %1980 = vmatmul.f32.vlgmr.msrb.gmra.mxu2 %v1690_v14  ;;  %v1675_v3 = vsel %vm1647_vm1, %v1216_v15, %v2184_v27  ;;  %v1687_v8 = vsel %vm1647_vm1, %v3218_v23, %v2183_v58  ;;  %v1224_v23 = vsel %vm559_vm0, %v1223_v45, %v3292_v61 }
 0x26a   :  { %v2177_v1 = vpop.permute.xlu1 %2176 }
 0x26b   :  { %v2179_v36 = vunpack.i.h.bf16 %v2177_v1  ;;  %v2178_v50 = vunpack.i.l.bf16 %v2177_v1 }
 0x26c   :  { %v2172_v12 = vpop.permute.xlu0 %2171 }
 0x26d   :  { %v2174_v39 = vunpack.i.h.bf16 %v2172_v12  ;;  %v2173_v13 = vunpack.i.l.bf16 %v2172_v12 }
 0x26e   :  { %v2197_v53 = vpop.permute.xlu2 %2196 }
 0x26f   :  { %v1682_v40 = vsel %vm1650_vm3, %v1680_v0, %v2174_v39  ;;  %v1694_v22 = vsel %vm1650_vm3, %v1692_v10, %v2173_v13  ;;  %v2199_v56 = vunpack.i.h.bf16 %v2197_v53  ;;  %v2198_v29 = vunpack.i.l.bf16 %v2197_v53 }
 0x270   :  { %v1684_v18 = vsel %vm1653_vm2, %v1682_v40, %v2179_v36  ;;  %v1696_v11 = vsel %vm1653_vm2, %v1694_v22, %v2178_v50 }
 0x271   :  { %1957 = vmatmul.f32.vlgmr.msrb.gmra.mxu1 %v1684_v18  ;;  %2003 = vmatmul.f32.vlgmr.msrb.gmra.mxu3 %v1696_v11  ;;  %v1681_v49 = vsel %vm1647_vm1, %v1224_v23, %v2199_v56  ;;  %v1693_v46 = vsel %vm1647_vm1, %v3212_v31, %v2198_v29 }
 0x27c   :  { %v2192_v32 = vpop.permute.xlu1 %2191 }
 0x27d   :  { %v2194_v19 = vunpack.i.h.bf16 %v2192_v32  ;;  %v2193_v35 = vunpack.i.l.bf16 %v2192_v32 }
 0x27e   :  { %v2187_v7 = vpop.permute.xlu0 %2186 }
 0x27f   :  { %v2189_v48 = vunpack.i.h.bf16 %v2187_v7  ;;  %v2188_v55 = vunpack.i.l.bf16 %v2187_v7 }
 0x281   :  { %v1677_v63 = vsel %vm1650_vm3, %v1675_v3, %v2189_v48  ;;  %v1689_v33 = vsel %vm1650_vm3, %v1687_v8, %v2188_v55 }
 0x282   :  { %v1679_v37 = vsel %vm1653_vm2, %v1677_v63, %v2194_v19  ;;  %v1691_v26 = vsel %vm1653_vm2, %v1689_v33, %v2193_v35 }
 0x283   :  { %1937 = vmatmul.f32.gmra.mxu0 %v1679_v37  ;;  %1983 = vmatmul.f32.gmra.mxu2 %v1691_v26 }
 0x284   :  { %v2207_v9 = vpop.permute.xlu1 %2206 }
 0x285   :  { %v2209_v28 = vunpack.i.h.bf16 %v2207_v9  ;;  %v2208_v44 = vunpack.i.l.bf16 %v2207_v9 }
 0x286   :  { %v2202_v60 = vpop.permute.xlu0 %2201 }
 0x287   :  { %v2204_v38 = vunpack.i.h.bf16 %v2202_v60  ;;  %v2203_v42 = vunpack.i.l.bf16 %v2202_v60 }
 0x289   :  { %v1683_v4 = vsel %vm1650_vm3, %v1681_v49, %v2204_v38  ;;  %v1695_v30 = vsel %vm1650_vm3, %v1693_v46, %v2203_v42 }
 0x28a   :  { %v1685_v2 = vsel %vm1653_vm2, %v1683_v4, %v2209_v28  ;;  %v1697_v16 = vsel %vm1653_vm2, %v1695_v30, %v2208_v44 }
 0x28b   :  { %1960 = vmatmul.f32.gmra.mxu1 %v1685_v2  ;;  %2006 = vmatmul.f32.gmra.mxu3 %v1697_v16 }
 0x28d   :  { %v1843_v21 = vpop.f32.mrf.mxu0 }
 0x293   :  { %v1889_v61 = vpop.f32.mrf.mxu2 }
 0x295   :  { %v1866_v52 = vpop.f32.mrf.mxu1 }
 0x296   :  { %v1867_v54 = vadd.f32 %v1866_v52, %v1843_v21 }
 0x298   :  { %v1890_v24 = vadd.f32 %v1889_v61, %v1867_v54 }
 0x29b   :  { %v1912_v47 = vpop.f32.mrf.mxu3 }
 0x29c   :  { %v1913_v62 = vadd.f32 %v1912_v47, %v1890_v24 }
 0x2d6   :  { %v1846_v43 = vpop.f32.mrf.mxu0 }
 0x2dc   :  { %v1892_v20 = vpop.f32.mrf.mxu2 }
 0x2de   :  { %v1869_v14 = vpop.f32.mrf.mxu1 }
 0x2df   :  { %v1870_v51 = vadd.f32 %v1869_v14, %v1846_v43 }
 0x2e1   :  { %v1893_v59 = vadd.f32 %v1892_v20, %v1870_v51 }
 0x2e4   :  { %v1915_v25 = vpop.f32.mrf.mxu3 }
 0x2e5   :  { %v1916_v36 = vadd.f32 %v1915_v25, %v1893_v59 }
 0x2e6   :  { %v1935_v31 = vpop.f32.mrf.mxu0 }
 0x2e7   :  { %v1936_v5 = vadd.f32 %v1935_v31, %v1913_v62 }
 0x2ec   :  { %v1981_v12 = vpop.f32.mrf.mxu2 }
 0x2ee   :  { %v1958_v6 = vpop.f32.mrf.mxu1 }
 0x2ef   :  { %v1959_v1 = vadd.f32 %v1958_v6, %v1936_v5 }
 0x2f1   :  { %v1982_v39 = vadd.f32 %v1981_v12, %v1959_v1 }
 0x2f4   :  { %v2004_v13 = vpop.f32.mrf.mxu3 }
 0x2f5   :  { %v2005_v34 = vadd.f32 %v2004_v13, %v1982_v39 }
 0x2f7   :  { %2010 = vst [vmem:[#allocation7] sm:$0xff] %v2005_v34 }
 0x300   :  { %v1938_v41 = vpop.f32.mrf.mxu0 }
 0x301   :  { %v1939_v50 = vadd.f32 %v1938_v41, %v1916_v36 }
 0x306   :  { %v1984_v40 = vpop.f32.mrf.mxu2 }
 0x308   :  { %v1961_v0 = vpop.f32.mrf.mxu1 }
 0x309   :  { %v1962_v10 = vadd.f32 %v1961_v0, %v1939_v50 }
 0x30b   :  { %v1985_v22 = vadd.f32 %v1984_v40, %v1962_v10 }
 0x30e   :  { %v2007_v18 = vpop.f32.mrf.mxu3 }
 0x30f   :  { %v2008_v11 = vadd.f32 %v2007_v18, %v1985_v22 }
 0x311   :  { %2011 = vst [vmem:[#allocation7 + $0x8] sm:$0xff] %v2008_v11 }
 0x312   :  { %2024 = dma.vmem_to_hbm [thread:$0]  %s2017_s23, 256, %s2019_s26, [#allocation4], %s2291_s17, %s2291_s17, %s2292_s18  }
 0x313   :  { %2288 = dma.done.wait [#allocation4], 256  }
 0x314   :  { %2289 = vsyncadd [#allocation4], 4294967040 }
 0x315   :  { %2029 = vsyncpa [#allocation3], 1 }
 0x316   :  { %2030 = vsyncpa [#allocation6], 1 }
 0x317   :  { %2031 = vsyncpa [#allocation4], 1 }

</bundles_post_ra>
